<compile_context>
chip_gen: v7x
topology: tpu7x:2x2x1
jax: 0.10.0
libtpu: 0.0.40
codegen_flags: <defaults>
</compile_context>

<pallas_src>
import jax
import jax.numpy as jnp
from jax.experimental import pallas as pl
from jax.experimental.pallas import tpu as pltpu

# Matmul-input dtype (f32 accumulate regardless). Set to jnp.float32 to recover
# exact PyTorch-f32 math at ~2x the DMA bytes.
COMPUTE_DTYPE = jnp.bfloat16


# ----------------------------------------------------------------------------
# helpers
# ----------------------------------------------------------------------------
def _round_up(x, m):
    return ((x + m - 1) // m) * m


def _cdiv(a, b):
    return -(-a // b)


def _choose_row_tiling(m, cap=1024, min_steps=4, align=16):
    """Pick (tile_rows TM, padded_rows Mp) for the matmul M dimension.

    Targets >= `min_steps` grid steps when M allows so (a) v7x can shard row
    blocks across both TensorCores via dimension_semantics=("parallel",) and
    (b) the BlockSpec software pipeline has iterations to overlap. Tile rows
    are aligned to 16 (safe sublane multiple for bf16 and f32 blocks) and
    capped at `cap`; Mp is derived from the actual M to limit last-tile waste.
    """
    m_al = _round_up(max(m, align), align)
    max_steps = m_al // align                 # smallest legal tile is `align`
    steps = min(max(min_steps, _cdiv(m_al, cap)), max_steps)
    tm = min(cap, _round_up(_cdiv(m_al, steps), align))
    mp = _round_up(m_al, tm)
    return tm, mp


# ----------------------------------------------------------------------------
# Pallas kernels
# ----------------------------------------------------------------------------
def _conv_relu_pool_kernel(c_ref, w_ref, b_ref, o_ref):
    """Fused conv (im2col matmul) + bias + ReLU + 2x2 max-pool epilogue.

    c_ref : (4, TM, K)  bf16 im2col rows for the four pool-window positions
    w_ref : (K, Np)     bf16 weights, output channels zero-padded to 128
    b_ref : (1, Np)     f32 bias
    o_ref : (TM, Np)    bf16 pooled, activated output rows

    relu(max_i(x_i @ W) + b) == maxpool2x2(relu(conv + b)) because the bias is
    shared across the four pool positions and relu is monotone.
    """
    w = w_ref[...]
    d0 = jnp.dot(c_ref[0], w, preferred_element_type=jnp.float32)
    d1 = jnp.dot(c_ref[1], w, preferred_element_type=jnp.float32)
    d2 = jnp.dot(c_ref[2], w, preferred_element_type=jnp.float32)
    d3 = jnp.dot(c_ref[3], w, preferred_element_type=jnp.float32)
    m = jnp.maximum(jnp.maximum(d0, d1), jnp.maximum(d2, d3))
    o_ref[...] = jnp.maximum(m + b_ref[...], 0.0).astype(o_ref.dtype)


def _mlp_head_kernel(x_ref, w1_ref, b1_ref, w2_ref, b2_ref, w3_ref, b3_ref,
                     o_ref):
    """fc1 -> relu -> fc2 -> relu -> fc3 fused in one kernel.

    Matmul inputs are bf16, accumulation and bias/ReLU are f32; intermediate
    activations are cast back to bf16 before the next MXU pass.
    """
    h = jnp.dot(x_ref[...], w1_ref[...], preferred_element_type=jnp.float32)
    h = jnp.maximum(h + b1_ref[...], 0.0).astype(x_ref.dtype)
    h = jnp.dot(h, w2_ref[...], preferred_element_type=jnp.float32)
    h = jnp.maximum(h + b2_ref[...], 0.0).astype(x_ref.dtype)
    h = jnp.dot(h, w3_ref[...], preferred_element_type=jnp.float32)
    o_ref[...] = (h + b3_ref[...]).astype(o_ref.dtype)


# ----------------------------------------------------------------------------
# Wrappers around pallas_call
# ----------------------------------------------------------------------------
def conv_relu_pool(x, wmat, bmat, *, oc, ksize):
    """Fused valid conv (stride 1) + ReLU + 2x2 max-pool.

    x    : (B, H, W, C) NHWC bf16
    wmat : (K, Np) bf16 im2col weight matrix, K ordered (kh, kw, c)
    bmat : (1, Np) f32 bias
    returns (B, OH//2, OW//2, oc) NHWC bf16.
    """
    B, H, W, C = x.shape
    K, Np = wmat.shape
    assert K == ksize * ksize * C
    OH, OW = H - ksize + 1, W - ksize + 1
    PH, PW = OH // 2, OW // 2
    M = B * PH * PW
    TM, Mp = _choose_row_tiling(M)

    # im2col glue (XLA): K row-order (kh, kw, c), matching the weight prep.
    # No K padding in HBM — the kernel block uses the true (full) K dim.
    pats = [x[:, kh:kh + OH, kw:kw + OW, :]
            for kh in range(ksize) for kw in range(ksize)]
    cols = jnp.stack(pats, axis=3).reshape(B, OH, OW, K)
    # Group the four 2x2 pool-window positions into a leading axis of size 4:
    # cols4[2*dy+dx, (b*PH+ph)*PW+pw, k] = patch at conv pixel (2ph+dy, 2pw+dx)
    cols4 = (cols.reshape(B, PH, 2, PW, 2, K)
                 .transpose(2, 4, 0, 1, 3, 5)
                 .reshape(4, M, K))
    cols4 = jnp.pad(cols4, ((0, 0), (0, Mp - M), (0, 0)))
    # TODO(synk): build the im2col patches inside the kernel (or fuse the whole
    # network into one pallas_call gridded over batch) to remove this XLA-side
    # materialization entirely.

    out = pl.pallas_call(
        _conv_relu_pool_kernel,
        out_shape=jax.ShapeDtypeStruct((Mp, Np), COMPUTE_DTYPE),
        grid=(Mp // TM,),
        in_specs=[
            pl.BlockSpec((4, TM, K), lambda i: (0, i, 0)),   # true K, no pad
            pl.BlockSpec((K, Np), lambda i: (0, 0)),         # VMEM-resident
            pl.BlockSpec((1, Np), lambda i: (0, 0)),
        ],
        out_specs=pl.BlockSpec((TM, Np), lambda i: (i, 0)),
        compiler_params=pltpu.CompilerParams(
            dimension_semantics=("parallel",)),
    )(cols4, wmat, bmat)

    # Padded rows/columns hold relu(bias) garbage — slice them off here.
    return out[:M, :oc].reshape(B, PH, PW, oc)


def mlp_head(x, w1, b1, w2, b2, w3, b3, *, output_dim):
    """Fused fc1->relu->fc2->relu->fc3.  x: (B, 400) bf16; weights prepared."""
    B, Din = x.shape
    D1p, D2p, Dop = w1.shape[1], w2.shape[1], w3.shape[1]
    TM, Mp = _choose_row_tiling(B)
    xp = jnp.pad(x, ((0, Mp - B), (0, 0))).astype(COMPUTE_DTYPE)

    out = pl.pallas_call(
        _mlp_head_kernel,
        out_shape=jax.ShapeDtypeStruct((Mp, Dop), jnp.float32),
        grid=(Mp // TM,),
        in_specs=[
            pl.BlockSpec((TM, Din), lambda i: (i, 0)),   # true K=400, no pad
            pl.BlockSpec((Din, D1p), lambda i: (0, 0)),
            pl.BlockSpec((1, D1p), lambda i: (0, 0)),
            pl.BlockSpec((D1p, D2p), lambda i: (0, 0)),
            pl.BlockSpec((1, D2p), lambda i: (0, 0)),
            pl.BlockSpec((D2p, Dop), lambda i: (0, 0)),
            pl.BlockSpec((1, Dop), lambda i: (0, 0)),
        ],
        out_specs=pl.BlockSpec((TM, Dop), lambda i: (i, 0)),
        compiler_params=pltpu.CompilerParams(
            dimension_semantics=("parallel",)),
    )(xp, w1, b1, w2, b2, w3, b3)

    return out[:B, :output_dim]


# ----------------------------------------------------------------------------
# Parameter init (deterministic, PyTorch-default-style uniform) and prep
# ----------------------------------------------------------------------------
def _uniform(key, shape, fan_in):
    bound = 1.0 / jnp.sqrt(jnp.float32(fan_in))
    return jax.random.uniform(key, shape, jnp.float32, -bound, bound)


def init_params(key, input_dim=400, hidden_dims=(120, 84), output_dim=10):
    ks = jax.random.split(key, 12)
    p = {}
    p["conv1_w"] = _uniform(ks[0], (6, 3, 5, 5), 3 * 5 * 5)
    p["conv1_b"] = _uniform(ks[1], (6,), 3 * 5 * 5)
    p["conv2_w"] = _uniform(ks[2], (16, 6, 5, 5), 6 * 5 * 5)
    p["conv2_b"] = _uniform(ks[3], (16,), 6 * 5 * 5)
    # fc weights stored as (in, out) so the kernel does x @ w directly; fc1's
    # input rows are in torch's NCHW flatten order (c*25 + h*5 + w).
    p["fc1_w"] = _uniform(ks[4], (input_dim, hidden_dims[0]), input_dim)
    p["fc1_b"] = _uniform(ks[5], (hidden_dims[0],), input_dim)
    p["fc2_w"] = _uniform(ks[6], (hidden_dims[0], hidden_dims[1]), hidden_dims[0])
    p["fc2_b"] = _uniform(ks[7], (hidden_dims[1],), hidden_dims[0])
    p["fc3_w"] = _uniform(ks[8], (hidden_dims[1], output_dim), hidden_dims[1])
    p["fc3_b"] = _uniform(ks[9], (output_dim,), hidden_dims[1])
    return p


def prepare_params(p, conv2_out_chw=(16, 5, 5)):
    """One-time weight relayout/pad/cast so the forward pass has no weight glue.

    * conv weights -> (K, 128) bf16 im2col matrices with (kh, kw, c) row order
    * fc1's input rows permuted from torch NCHW flatten order (c, h, w) to the
      NHWC flatten order (h, w, c) used by the conv2 activation
    * hidden / output dims zero-padded to lane-dense multiples of 128
    * biases kept f32 (added on the f32 accumulator)
    """
    prep = {}
    for name in ("conv1", "conv2"):
        w, b = p[name + "_w"], p[name + "_b"]
        OC, C, KH, KW = w.shape
        K = KH * KW * C
        Np = _round_up(OC, 128)
        wmat = w.transpose(2, 3, 1, 0).reshape(K, OC)        # (kh, kw, c) x OC
        prep[name + "_w"] = jnp.pad(wmat, ((0, 0), (0, Np - OC))).astype(COMPUTE_DTYPE)
        prep[name + "_b"] = jnp.pad(b, (0, Np - OC)).reshape(1, Np).astype(jnp.float32)

    C, H, W = conv2_out_chw
    w1, b1 = p["fc1_w"], p["fc1_b"]
    Din, D1 = w1.shape
    w1 = w1.reshape(C, H, W, D1).transpose(1, 2, 0, 3).reshape(Din, D1)
    D1p = _round_up(D1, 128)
    prep["fc1_w"] = jnp.pad(w1, ((0, 0), (0, D1p - D1))).astype(COMPUTE_DTYPE)
    prep["fc1_b"] = jnp.pad(b1, (0, D1p - D1)).reshape(1, D1p).astype(jnp.float32)

    w2, b2 = p["fc2_w"], p["fc2_b"]
    D2 = w2.shape[1]
    D2p = _round_up(D2, 128)
    prep["fc2_w"] = jnp.pad(w2, ((0, D1p - D1), (0, D2p - D2))).astype(COMPUTE_DTYPE)
    prep["fc2_b"] = jnp.pad(b2, (0, D2p - D2)).reshape(1, D2p).astype(jnp.float32)

    w3, b3 = p["fc3_w"], p["fc3_b"]
    Do = w3.shape[1]
    Dop = _round_up(Do, 128)
    prep["fc3_w"] = jnp.pad(w3, ((0, D2p - D2), (0, Dop - Do))).astype(COMPUTE_DTYPE)
    prep["fc3_b"] = jnp.pad(b3, (0, Dop - Do)).reshape(1, Dop).astype(jnp.float32)
    return prep


# ----------------------------------------------------------------------------
# Forward
# ----------------------------------------------------------------------------
def simple_cnn_forward(prep, x, *, conv_channels=(6, 16), ksize=5,
                       output_dim=10):
    # x: (B, 3, 32, 32) f32, NCHW (PyTorch convention).
    # One NHWC relayout at entry (cast to bf16 first to halve its traffic).
    x = jnp.transpose(x.astype(COMPUTE_DTYPE), (0, 2, 3, 1))
    x = conv_relu_pool(x, prep["conv1_w"], prep["conv1_b"],
                       oc=conv_channels[0], ksize=ksize)      # (B, 14, 14, 6)
    x = conv_relu_pool(x, prep["conv2_w"], prep["conv2_b"],
                       oc=conv_channels[1], ksize=ksize)      # (B, 5, 5, 16)
    # NHWC flatten; fc1's rows were permuted in prepare_params to match, so
    # no NHWC->NCHW activation transpose is needed here.
    x = x.reshape(x.shape[0], -1)                              # (B, 400)
    return mlp_head(x, prep["fc1_w"], prep["fc1_b"],
                    prep["fc2_w"], prep["fc2_b"],
                    prep["fc3_w"], prep["fc3_b"], output_dim=output_dim)


if __name__ == "__main__":
    key = jax.random.PRNGKey(0)
    k_x, k_p = jax.random.split(key)

    batch = 2
    x = jax.random.normal(k_x, (batch, 3, 32, 32), dtype=jnp.float32)
    params = init_params(k_p, input_dim=16 * 5 * 5, hidden_dims=(120, 84),
                         output_dim=10)
    prep = prepare_params(params)        # one-time weight relayout / pad / cast

    fwd = jax.jit(simple_cnn_forward)
    out = fwd(prep, x)
    jax.block_until_ready(out)

    assert out.shape == (batch, 10), out.shape
    assert out.dtype == jnp.float32
    print("KERNEL_OK")
</pallas_src>

<mosaic_0001>
module attributes {stable_mosaic.version = 11 : i64} {
  func.func @_conv_relu_pool_kernel(%arg0: i32, %arg1: memref<4x112x75xbf16, #tpu.memory_space<vmem>>, %arg2: memref<75x128xbf16, #tpu.memory_space<vmem>>, %arg3: memref<1x128xf32, #tpu.memory_space<vmem>>, %arg4: memref<112x128xbf16, #tpu.memory_space<vmem>>) attributes {dimension_semantics = [#tpu.dimension_semantics<parallel>], iteration_bounds = array<i64: 4>, scalar_prefetch = 0 : i64, scratch_operands = 0 : i64, tpu.core_type = #tpu.core_type<tc>, window_params = [{transform_indices = @transform_0, window_bounds = array<i64: 4, 112, 75>}, {pipeline_mode = #tpu.pipeline_mode<synchronous>, transform_indices = @transform_1, window_bounds = array<i64: 75, 128>}, {pipeline_mode = #tpu.pipeline_mode<synchronous>, transform_indices = @transform_2, window_bounds = array<i64: 1, 128>}, {transform_indices = @transform_3, window_bounds = array<i64: 112, 128>}]} {
    %c0 = arith.constant 0 : index
    %c0_0 = arith.constant 0 : index
    %0 = vector.load %arg2[%c0, %c0_0] : memref<75x128xbf16, #tpu.memory_space<vmem>>, vector<75x128xbf16>
    %c0_1 = arith.constant 0 : index
    %c0_2 = arith.constant 0 : index
    %c0_3 = arith.constant 0 : index
    %1 = vector.load %arg1[%c0_1, %c0_2, %c0_3] : memref<4x112x75xbf16, #tpu.memory_space<vmem>>, vector<1x112x75xbf16>
    %2 = vector.shape_cast %1 : vector<1x112x75xbf16> to vector<112x75xbf16>
    %cst = arith.constant dense<0.000000e+00> : vector<112x128xf32>
    %3 = tpu.matmul %2, %0, %cst {dimension_numbers = #tpu.dot_dimension_numbers<[1], [0], [0], [1], [0, 0, 1, 1], [], []>} : vector<112x75xbf16>, vector<75x128xbf16>, vector<112x128xf32> -> vector<112x128xf32>
    %c1 = arith.constant 1 : index
    %c0_4 = arith.constant 0 : index
    %c0_5 = arith.constant 0 : index
    %4 = vector.load %arg1[%c1, %c0_4, %c0_5] : memref<4x112x75xbf16, #tpu.memory_space<vmem>>, vector<1x112x75xbf16>
    %5 = vector.shape_cast %4 : vector<1x112x75xbf16> to vector<112x75xbf16>
    %cst_6 = arith.constant dense<0.000000e+00> : vector<112x128xf32>
    %6 = tpu.matmul %5, %0, %cst_6 {dimension_numbers = #tpu.dot_dimension_numbers<[1], [0], [0], [1], [0, 0, 1, 1], [], []>} : vector<112x75xbf16>, vector<75x128xbf16>, vector<112x128xf32> -> vector<112x128xf32>
    %c2 = arith.constant 2 : index
    %c0_7 = arith.constant 0 : index
    %c0_8 = arith.constant 0 : index
    %7 = vector.load %arg1[%c2, %c0_7, %c0_8] : memref<4x112x75xbf16, #tpu.memory_space<vmem>>, vector<1x112x75xbf16>
    %8 = vector.shape_cast %7 : vector<1x112x75xbf16> to vector<112x75xbf16>
    %cst_9 = arith.constant dense<0.000000e+00> : vector<112x128xf32>
    %9 = tpu.matmul %8, %0, %cst_9 {dimension_numbers = #tpu.dot_dimension_numbers<[1], [0], [0], [1], [0, 0, 1, 1], [], []>} : vector<112x75xbf16>, vector<75x128xbf16>, vector<112x128xf32> -> vector<112x128xf32>
    %c3 = arith.constant 3 : index
    %c0_10 = arith.constant 0 : index
    %c0_11 = arith.constant 0 : index
    %10 = vector.load %arg1[%c3, %c0_10, %c0_11] : memref<4x112x75xbf16, #tpu.memory_space<vmem>>, vector<1x112x75xbf16>
    %11 = vector.shape_cast %10 : vector<1x112x75xbf16> to vector<112x75xbf16>
    %cst_12 = arith.constant dense<0.000000e+00> : vector<112x128xf32>
    %12 = tpu.matmul %11, %0, %cst_12 {dimension_numbers = #tpu.dot_dimension_numbers<[1], [0], [0], [1], [0, 0, 1, 1], [], []>} : vector<112x75xbf16>, vector<75x128xbf16>, vector<112x128xf32> -> vector<112x128xf32>
    %13 = arith.maximumf %3, %6 : vector<112x128xf32>
    %14 = arith.maximumf %9, %12 : vector<112x128xf32>
    %15 = arith.maximumf %13, %14 : vector<112x128xf32>
    %c0_13 = arith.constant 0 : index
    %c0_14 = arith.constant 0 : index
    %16 = vector.load %arg3[%c0_13, %c0_14] : memref<1x128xf32, #tpu.memory_space<vmem>>, vector<1x128xf32>
    %17 = vector.broadcast %16 : vector<1x128xf32> to vector<112x128xf32>
    %18 = arith.addf %15, %17 : vector<112x128xf32>
    %cst_15 = arith.constant 0.000000e+00 : f32
    %19 = vector.broadcast %cst_15 : f32 to vector<112x128xf32>
    %20 = arith.maximumf %18, %19 : vector<112x128xf32>
    %21 = arith.truncf %20 : vector<112x128xf32> to vector<112x128xbf16>
    %c0_16 = arith.constant 0 : index
    %c0_17 = arith.constant 0 : index
    %22 = vector.load %arg4[%c0_16, %c0_17] : memref<112x128xbf16, #tpu.memory_space<vmem>>, vector<112x128xbf16>
    tpu.vector_store %arg4[%c0_16, %c0_17], %21 {strides = array<i32>} : memref<112x128xbf16, #tpu.memory_space<vmem>>, vector<112x128xbf16>,
    return
  }
  func.func @transform_0(%arg0: i32) -> (i32, i32, i32) {
    %c0_i32 = arith.constant 0 : i32
    %c0_i32_0 = arith.constant 0 : i32
    %c0_i32_1 = arith.constant 0 : i32
    return %c0_i32, %arg0, %c0_i32_0 : i32, i32, i32
  }
  func.func @transform_1(%arg0: i32) -> (i32, i32) {
    %c0_i32 = arith.constant 0 : i32
    %c0_i32_0 = arith.constant 0 : i32
    %c0_i32_1 = arith.constant 0 : i32
    return %c0_i32, %c0_i32_0 : i32, i32
  }
  func.func @transform_2(%arg0: i32) -> (i32, i32) {
    %c0_i32 = arith.constant 0 : i32
    %c0_i32_0 = arith.constant 0 : i32
    %c0_i32_1 = arith.constant 0 : i32
    return %c0_i32, %c0_i32_0 : i32, i32
  }
  func.func @transform_3(%arg0: i32) -> (i32, i32) {
    %c0_i32 = arith.constant 0 : i32
    %c0_i32_0 = arith.constant 0 : i32
    return %arg0, %c0_i32 : i32, i32
  }
}

module attributes {stable_mosaic.version = 11 : i64} {
  func.func @_conv_relu_pool_kernel(%arg0: i32, %arg1: memref<4x16x150xbf16, #tpu.memory_space<vmem>>, %arg2: memref<150x128xbf16, #tpu.memory_space<vmem>>, %arg3: memref<1x128xf32, #tpu.memory_space<vmem>>, %arg4: memref<16x128xbf16, #tpu.memory_space<vmem>>) attributes {dimension_semantics = [#tpu.dimension_semantics<parallel>], iteration_bounds = array<i64: 4>, scalar_prefetch = 0 : i64, scratch_operands = 0 : i64, tpu.core_type = #tpu.core_type<tc>, window_params = [{transform_indices = @transform_0, window_bounds = array<i64: 4, 16, 150>}, {pipeline_mode = #tpu.pipeline_mode<synchronous>, transform_indices = @transform_1, window_bounds = array<i64: 150, 128>}, {pipeline_mode = #tpu.pipeline_mode<synchronous>, transform_indices = @transform_2, window_bounds = array<i64: 1, 128>}, {transform_indices = @transform_3, window_bounds = array<i64: 16, 128>}]} {
    %c0 = arith.constant 0 : index
    %c0_0 = arith.constant 0 : index
    %0 = vector.load %arg2[%c0, %c0_0] : memref<150x128xbf16, #tpu.memory_space<vmem>>, vector<150x128xbf16>
    %c0_1 = arith.constant 0 : index
    %c0_2 = arith.constant 0 : index
    %c0_3 = arith.constant 0 : index
    %1 = vector.load %arg1[%c0_1, %c0_2, %c0_3] : memref<4x16x150xbf16, #tpu.memory_space<vmem>>, vector<1x16x150xbf16>
    %2 = vector.shape_cast %1 : vector<1x16x150xbf16> to vector<16x150xbf16>
    %cst = arith.constant dense<0.000000e+00> : vector<16x128xf32>
    %3 = tpu.matmul %2, %0, %cst {dimension_numbers = #tpu.dot_dimension_numbers<[1], [0], [0], [1], [0, 0, 1, 1], [], []>} : vector<16x150xbf16>, vector<150x128xbf16>, vector<16x128xf32> -> vector<16x128xf32>
    %c1 = arith.constant 1 : index
    %c0_4 = arith.constant 0 : index
    %c0_5 = arith.constant 0 : index
    %4 = vector.load %arg1[%c1, %c0_4, %c0_5] : memref<4x16x150xbf16, #tpu.memory_space<vmem>>, vector<1x16x150xbf16>
    %5 = vector.shape_cast %4 : vector<1x16x150xbf16> to vector<16x150xbf16>
    %cst_6 = arith.constant dense<0.000000e+00> : vector<16x128xf32>
    %6 = tpu.matmul %5, %0, %cst_6 {dimension_numbers = #tpu.dot_dimension_numbers<[1], [0], [0], [1], [0, 0, 1, 1], [], []>} : vector<16x150xbf16>, vector<150x128xbf16>, vector<16x128xf32> -> vector<16x128xf32>
    %c2 = arith.constant 2 : index
    %c0_7 = arith.constant 0 : index
    %c0_8 = arith.constant 0 : index
    %7 = vector.load %arg1[%c2, %c0_7, %c0_8] : memref<4x16x150xbf16, #tpu.memory_space<vmem>>, vector<1x16x150xbf16>
    %8 = vector.shape_cast %7 : vector<1x16x150xbf16> to vector<16x150xbf16>
    %cst_9 = arith.constant dense<0.000000e+00> : vector<16x128xf32>
    %9 = tpu.matmul %8, %0, %cst_9 {dimension_numbers = #tpu.dot_dimension_numbers<[1], [0], [0], [1], [0, 0, 1, 1], [], []>} : vector<16x150xbf16>, vector<150x128xbf16>, vector<16x128xf32> -> vector<16x128xf32>
    %c3 = arith.constant 3 : index
    %c0_10 = arith.constant 0 : index
    %c0_11 = arith.constant 0 : index
    %10 = vector.load %arg1[%c3, %c0_10, %c0_11] : memref<4x16x150xbf16, #tpu.memory_space<vmem>>, vector<1x16x150xbf16>
    %11 = vector.shape_cast %10 : vector<1x16x150xbf16> to vector<16x150xbf16>
    %cst_12 = arith.constant dense<0.000000e+00> : vector<16x128xf32>
    %12 = tpu.matmul %11, %0, %cst_12 {dimension_numbers = #tpu.dot_dimension_numbers<[1], [0], [0], [1], [0, 0, 1, 1], [], []>} : vector<16x150xbf16>, vector<150x128xbf16>, vector<16x128xf32> -> vector<16x128xf32>
    %13 = arith.maximumf %3, %6 : vector<16x128xf32>
    %14 = arith.maximumf %9, %12 : vector<16x128xf32>
    %15 = arith.maximumf %13, %14 : vector<16x128xf32>
    %c0_13 = arith.constant 0 : index
    %c0_14 = arith.constant 0 : index
    %16 = vector.load %arg3[%c0_13, %c0_14] : memref<1x128xf32, #tpu.memory_space<vmem>>, vector<1x128xf32>
    %17 = vector.broadcast %16 : vector<1x128xf32> to vector<16x128xf32>
    %18 = arith.addf %15, %17 : vector<16x128xf32>
    %cst_15 = arith.constant 0.000000e+00 : f32
    %19 = vector.broadcast %cst_15 : f32 to vector<16x128xf32>
    %20 = arith.maximumf %18, %19 : vector<16x128xf32>
    %21 = arith.truncf %20 : vector<16x128xf32> to vector<16x128xbf16>
    %c0_16 = arith.constant 0 : index
    %c0_17 = arith.constant 0 : index
    %22 = vector.load %arg4[%c0_16, %c0_17] : memref<16x128xbf16, #tpu.memory_space<vmem>>, vector<16x128xbf16>
    tpu.vector_store %arg4[%c0_16, %c0_17], %21 {strides = array<i32>} : memref<16x128xbf16, #tpu.memory_space<vmem>>, vector<16x128xbf16>,
    return
  }
  func.func @transform_0(%arg0: i32) -> (i32, i32, i32) {
    %c0_i32 = arith.constant 0 : i32
    %c0_i32_0 = arith.constant 0 : i32
    %c0_i32_1 = arith.constant 0 : i32
    return %c0_i32, %arg0, %c0_i32_0 : i32, i32, i32
  }
  func.func @transform_1(%arg0: i32) -> (i32, i32) {
    %c0_i32 = arith.constant 0 : i32
    %c0_i32_0 = arith.constant 0 : i32
    %c0_i32_1 = arith.constant 0 : i32
    return %c0_i32, %c0_i32_0 : i32, i32
  }
  func.func @transform_2(%arg0: i32) -> (i32, i32) {
    %c0_i32 = arith.constant 0 : i32
    %c0_i32_0 = arith.constant 0 : i32
    %c0_i32_1 = arith.constant 0 : i32
    return %c0_i32, %c0_i32_0 : i32, i32
  }
  func.func @transform_3(%arg0: i32) -> (i32, i32) {
    %c0_i32 = arith.constant 0 : i32
    %c0_i32_0 = arith.constant 0 : i32
    return %arg0, %c0_i32 : i32, i32
  }
}

module attributes {stable_mosaic.version = 11 : i64} {
  func.func @_mlp_head_kernel(%arg0: i32, %arg1: memref<16x400xbf16, #tpu.memory_space<vmem>>, %arg2: memref<400x128xbf16, #tpu.memory_space<vmem>>, %arg3: memref<1x128xf32, #tpu.memory_space<vmem>>, %arg4: memref<128x128xbf16, #tpu.memory_space<vmem>>, %arg5: memref<1x128xf32, #tpu.memory_space<vmem>>, %arg6: memref<128x128xbf16, #tpu.memory_space<vmem>>, %arg7: memref<1x128xf32, #tpu.memory_space<vmem>>, %arg8: memref<16x128xf32, #tpu.memory_space<vmem>>) attributes {dimension_semantics = [#tpu.dimension_semantics<parallel>], iteration_bounds = array<i64: 1>, scalar_prefetch = 0 : i64, scratch_operands = 0 : i64, tpu.core_type = #tpu.core_type<tc>, window_params = [{transform_indices = @transform_0, window_bounds = array<i64: 16, 400>}, {pipeline_mode = #tpu.pipeline_mode<synchronous>, transform_indices = @transform_1, window_bounds = array<i64: 400, 128>}, {pipeline_mode = #tpu.pipeline_mode<synchronous>, transform_indices = @transform_2, window_bounds = array<i64: 1, 128>}, {pipeline_mode = #tpu.pipeline_mode<synchronous>, transform_indices = @transform_3, window_bounds = array<i64: 128, 128>}, {pipeline_mode = #tpu.pipeline_mode<synchronous>, transform_indices = @transform_4, window_bounds = array<i64: 1, 128>}, {pipeline_mode = #tpu.pipeline_mode<synchronous>, transform_indices = @transform_5, window_bounds = array<i64: 128, 128>}, {pipeline_mode = #tpu.pipeline_mode<synchronous>, transform_indices = @transform_6, window_bounds = array<i64: 1, 128>}, {transform_indices = @transform_7, window_bounds = array<i64: 16, 128>}]} {
    %c0 = arith.constant 0 : index
    %c0_0 = arith.constant 0 : index
    %0 = vector.load %arg1[%c0, %c0_0] : memref<16x400xbf16, #tpu.memory_space<vmem>>, vector<16x400xbf16>
    %c0_1 = arith.constant 0 : index
    %c0_2 = arith.constant 0 : index
    %1 = vector.load %arg2[%c0_1, %c0_2] : memref<400x128xbf16, #tpu.memory_space<vmem>>, vector<400x128xbf16>
    %cst = arith.constant dense<0.000000e+00> : vector<16x128xf32>
    %2 = tpu.matmul %0, %1, %cst {dimension_numbers = #tpu.dot_dimension_numbers<[1], [0], [0], [1], [0, 0, 1, 1], [], []>} : vector<16x400xbf16>, vector<400x128xbf16>, vector<16x128xf32> -> vector<16x128xf32>
    %c0_3 = arith.constant 0 : index
    %c0_4 = arith.constant 0 : index
    %3 = vector.load %arg3[%c0_3, %c0_4] : memref<1x128xf32, #tpu.memory_space<vmem>>, vector<1x128xf32>
    %4 = vector.broadcast %3 : vector<1x128xf32> to vector<16x128xf32>
    %5 = arith.addf %2, %4 : vector<16x128xf32>
    %cst_5 = arith.constant 0.000000e+00 : f32
    %6 = vector.broadcast %cst_5 : f32 to vector<16x128xf32>
    %7 = arith.maximumf %5, %6 : vector<16x128xf32>
    %8 = arith.truncf %7 : vector<16x128xf32> to vector<16x128xbf16>
    %c0_6 = arith.constant 0 : index
    %c0_7 = arith.constant 0 : index
    %9 = vector.load %arg4[%c0_6, %c0_7] : memref<128x128xbf16, #tpu.memory_space<vmem>>, vector<128x128xbf16>
    %cst_8 = arith.constant dense<0.000000e+00> : vector<16x128xf32>
    %10 = tpu.matmul %8, %9, %cst_8 {dimension_numbers = #tpu.dot_dimension_numbers<[1], [0], [0], [1], [0, 0, 1, 1], [], []>} : vector<16x128xbf16>, vector<128x128xbf16>, vector<16x128xf32> -> vector<16x128xf32>
    %c0_9 = arith.constant 0 : index
    %c0_10 = arith.constant 0 : index
    %11 = vector.load %arg5[%c0_9, %c0_10] : memref<1x128xf32, #tpu.memory_space<vmem>>, vector<1x128xf32>
    %12 = vector.broadcast %11 : vector<1x128xf32> to vector<16x128xf32>
    %13 = arith.addf %10, %12 : vector<16x128xf32>
    %cst_11 = arith.constant 0.000000e+00 : f32
    %14 = vector.broadcast %cst_11 : f32 to vector<16x128xf32>
    %15 = arith.maximumf %13, %14 : vector<16x128xf32>
    %16 = arith.truncf %15 : vector<16x128xf32> to vector<16x128xbf16>
    %c0_12 = arith.constant 0 : index
    %c0_13 = arith.constant 0 : index
    %17 = vector.load %arg6[%c0_12, %c0_13] : memref<128x128xbf16, #tpu.memory_space<vmem>>, vector<128x128xbf16>
    %cst_14 = arith.constant dense<0.000000e+00> : vector<16x128xf32>
    %18 = tpu.matmul %16, %17, %cst_14 {dimension_numbers = #tpu.dot_dimension_numbers<[1], [0], [0], [1], [0, 0, 1, 1], [], []>} : vector<16x128xbf16>, vector<128x128xbf16>, vector<16x128xf32> -> vector<16x128xf32>
    %c0_15 = arith.constant 0 : index
    %c0_16 = arith.constant 0 : index
    %19 = vector.load %arg7[%c0_15, %c0_16] : memref<1x128xf32, #tpu.memory_space<vmem>>, vector<1x128xf32>
    %20 = vector.broadcast %19 : vector<1x128xf32> to vector<16x128xf32>
    %21 = arith.addf %18, %20 : vector<16x128xf32>
    %c0_17 = arith.constant 0 : index
    %c0_18 = arith.constant 0 : index
    %22 = vector.load %arg8[%c0_17, %c0_18] : memref<16x128xf32, #tpu.memory_space<vmem>>, vector<16x128xf32>
    tpu.vector_store %arg8[%c0_17, %c0_18], %21 {strides = array<i32>} : memref<16x128xf32, #tpu.memory_space<vmem>>, vector<16x128xf32>,
    return
  }
  func.func @transform_0(%arg0: i32) -> (i32, i32) {
    %c0_i32 = arith.constant 0 : i32
    %c0_i32_0 = arith.constant 0 : i32
    return %arg0, %c0_i32 : i32, i32
  }
  func.func @transform_1(%arg0: i32) -> (i32, i32) {
    %c0_i32 = arith.constant 0 : i32
    %c0_i32_0 = arith.constant 0 : i32
    %c0_i32_1 = arith.constant 0 : i32
    return %c0_i32, %c0_i32_0 : i32, i32
  }
  func.func @transform_2(%arg0: i32) -> (i32, i32) {
    %c0_i32 = arith.constant 0 : i32
    %c0_i32_0 = arith.constant 0 : i32
    %c0_i32_1 = arith.constant 0 : i32
    return %c0_i32, %c0_i32_0 : i32, i32
  }
  func.func @transform_3(%arg0: i32) -> (i32, i32) {
    %c0_i32 = arith.constant 0 : i32
    %c0_i32_0 = arith.constant 0 : i32
    %c0_i32_1 = arith.constant 0 : i32
    return %c0_i32, %c0_i32_0 : i32, i32
  }
  func.func @transform_4(%arg0: i32) -> (i32, i32) {
    %c0_i32 = arith.constant 0 : i32
    %c0_i32_0 = arith.constant 0 : i32
    %c0_i32_1 = arith.constant 0 : i32
    return %c0_i32, %c0_i32_0 : i32, i32
  }
  func.func @transform_5(%arg0: i32) -> (i32, i32) {
    %c0_i32 = arith.constant 0 : i32
    %c0_i32_0 = arith.constant 0 : i32
    %c0_i32_1 = arith.constant 0 : i32
    return %c0_i32, %c0_i32_0 : i32, i32
  }
  func.func @transform_6(%arg0: i32) -> (i32, i32) {
    %c0_i32 = arith.constant 0 : i32
    %c0_i32_0 = arith.constant 0 : i32
    %c0_i32_1 = arith.constant 0 : i32
    return %c0_i32, %c0_i32_0 : i32, i32
  }
  func.func @transform_7(%arg0: i32) -> (i32, i32) {
    %c0_i32 = arith.constant 0 : i32
    %c0_i32_0 = arith.constant 0 : i32
    return %arg0, %c0_i32 : i32, i32
  }
}

</mosaic_0001>

<bundles_post_ra>
// kernel: simple_cnn_forward.3
= control target key start
LH: loop header
LB: loop body
LE: loop exit
PB: predicated region body
PF: predicated region fallthrough
CT: control target
= control target key end

     0   :  { %s1823_s12 = smov 0   ;;  %s1825_s13 = smov 0   ;;  %s2238_s0 = inlined_call_operand.vmem [shape: bf16[4,448,75], index: 0, kind: input, shape index: {}]   ;;  %s2239_s1 = inlined_call_operand.vmem [shape: bf16[75,128], index: 1, kind: input, shape index: {}]   ;;  %s2240_s2 = inlined_call_operand.vmem [shape: f32[1,128], index: 2, kind: input, shape index: {}]   ;;  %s2241_s3 = inlined_call_operand.vmem [shape: bf16[448,128], index: 3, kind: output, shape index: {}]  }
   0x1   :  { %s1827_s14 = smov 0  }
   0x2 LB: > { %s1331_s15 = sadd.s32 4294967295, %s1798_s14   ;;  %s1840_s16 = sadd.s32 1, %s1798_s14   ;;  %s1798_s14 = sphi %s1827_s14, %s2244_s14   ;;  %s1794_s13 = sphi %s1825_s13, %s2243_s13   ;;  %s1790_s12 = sphi %s1823_s12, %s2242_s12  }
   0x3   : > { %s17_s17 = ssub.s32 %s1798_s14, %s1840_s16  ;;  %s20_s18 = sadd.s32 1, %s1794_s13 }
   0x4   : > { %p18_p0 = scmp.eq.s32.totalorder %s17_s17, 0  ;;  %p27_p1 = scmp.ne.s32.totalorder %s1794_s13, %s1790_s12 }
   0x5   : > { %p28_p2 = scmp.eq.s32.totalorder %s1798_s14, 0  ;;  %p1334_p4 = scmp.ge.s32.totalorder %s1798_s14, 4 }
   0x6   : > { %s1849_s19 = scalar_select %p18_p0, %s1794_s13, %s20_s18  }
   0x7   : > { %p29_p3 = por %p28_p2, %p27_p1  ;;  %127 = sbr.rel (%p1334_p4) target bundleno = 33 (0x21), region = 24 }
   0xe   : > { %130 = sbr.rel (!%p29_p3) target bundleno = 33 (0x21), region = 28  ;;  %s132_s20 = sand.u32 (%p29_p3), 1, %s1794_s13  }
   0xf   : > { %s1458_s21 = smul.u32 (%p29_p3), 56, %s1798_s14 }
  0x10   : > { %s1714_s22 = smul.u32 (%p29_p3), 224, %s132_s20 }
  0x11   : > { %s1857_s25 = scalar_lea.vmem (%p29_p3), %s2238_s0, %s1458_s21 }
  0x12   : > { %v153_v0 = vld [vmem:[%s1857_s25] sm:$0xff] (%p29_p3)   ;;  %v157_v1 = vld [vmem:[%s1857_s25 + $0x8] sm:$0xff] (%p29_p3)   ;;  %v161_v2 = vld [vmem:[%s1857_s25 + $0x10] sm:$0xff] (%p29_p3)   ;;  %s1862_s26 = scalar_lea.vmem (%p29_p3), [#allocation2], %s1714_s22 }
  0x13   : > { %154 = vst [vmem:[%s1862_s26] sm:$0xff] (%p29_p3), %v153_v0   ;;  %158 = vst [vmem:[%s1862_s26 + $0x8] sm:$0xff] (%p29_p3), %v157_v1   ;;  %v165_v3 = vld [vmem:[%s1857_s25 + $0x18] sm:$0xff] (%p29_p3)   ;;  %v169_v4 = vld [vmem:[%s1857_s25 + $0x20] sm:$0xff] (%p29_p3)  }
  0x14   : > { %162 = vst [vmem:[%s1862_s26 + $0x10] sm:$0xff] (%p29_p3), %v161_v2   ;;  %v173_v5 = vld [vmem:[%s1857_s25 + $0x28] sm:$0xff] (%p29_p3)   ;;  %166 = vst [vmem:[%s1862_s26 + $0x18] sm:$0xff] (%p29_p3), %v165_v3   ;;  %v177_v6 = vld [vmem:[%s1857_s25 + $0x30] sm:$0xff] (%p29_p3)  }
  0x15   : > { %170 = vst [vmem:[%s1862_s26 + $0x20] sm:$0xff] %v169_v4   ;;  %174 = vst [vmem:[%s1862_s26 + $0x28] sm:$0xff] %v173_v5   ;;  %v181_v7 = vld [vmem:[%s1857_s25 + $0xe0] sm:$0xff]   ;;  %v185_v8 = vld [vmem:[%s1857_s25 + $0xe8] sm:$0xff]  }
  0x16   : > { %178 = vst [vmem:[%s1862_s26 + $0x30] sm:$0xff] %v177_v6   ;;  %182 = vst [vmem:[%s1862_s26 + $0x38] sm:$0xff] %v181_v7   ;;  %v189_v9 = vld [vmem:[%s1857_s25 + $0xf0] sm:$0xff]   ;;  %v193_v10 = vld [vmem:[%s1857_s25 + $0xf8] sm:$0xff]  }
  0x17   : > { %186 = vst [vmem:[%s1862_s26 + $0x40] sm:$0xff] %v185_v8   ;;  %v197_v11 = vld [vmem:[%s1857_s25 + $0x100] sm:$0xff]   ;;  %190 = vst [vmem:[%s1862_s26 + $0x48] sm:$0xff] %v189_v9   ;;  %v201_v12 = vld [vmem:[%s1857_s25 + $0x108] sm:$0xff]  }
  0x18   : > { %194 = vst [vmem:[%s1862_s26 + $0x50] sm:$0xff] %v193_v10   ;;  %198 = vst [vmem:[%s1862_s26 + $0x58] sm:$0xff] %v197_v11   ;;  %v205_v13 = vld [vmem:[%s1857_s25 + $0x110] sm:$0xff]   ;;  %v209_v14 = vld [vmem:[%s1857_s25 + $0x1c0] sm:$0xff]  }
  0x19   : > { %202 = vst [vmem:[%s1862_s26 + $0x60] sm:$0xff] %v201_v12   ;;  %206 = vst [vmem:[%s1862_s26 + $0x68] sm:$0xff] %v205_v13   ;;  %v213_v15 = vld [vmem:[%s1857_s25 + $0x1c8] sm:$0xff]   ;;  %v217_v16 = vld [vmem:[%s1857_s25 + $0x1d0] sm:$0xff]  }
  0x1a   : > { %210 = vst [vmem:[%s1862_s26 + $0x70] sm:$0xff] %v209_v14   ;;  %v221_v17 = vld [vmem:[%s1857_s25 + $0x1d8] sm:$0xff]   ;;  %214 = vst [vmem:[%s1862_s26 + $0x78] sm:$0xff] %v213_v15   ;;  %v225_v18 = vld [vmem:[%s1857_s25 + $0x1e0] sm:$0xff]  }
  0x1b   : > { %218 = vst [vmem:[%s1862_s26 + $0x80] sm:$0xff] %v217_v16   ;;  %222 = vst [vmem:[%s1862_s26 + $0x88] sm:$0xff] %v221_v17   ;;  %v229_v19 = vld [vmem:[%s1857_s25 + $0x1e8] sm:$0xff]   ;;  %v233_v20 = vld [vmem:[%s1857_s25 + $0x1f0] sm:$0xff]  }
  0x1c   : > { %226 = vst [vmem:[%s1862_s26 + $0x90] sm:$0xff] %v225_v18   ;;  %230 = vst [vmem:[%s1862_s26 + $0x98] sm:$0xff] %v229_v19   ;;  %v237_v21 = vld [vmem:[%s1857_s25 + $0x2a0] sm:$0xff]   ;;  %v241_v22 = vld [vmem:[%s1857_s25 + $0x2a8] sm:$0xff]  }
  0x1d   : > { %234 = vst [vmem:[%s1862_s26 + $0xa0] sm:$0xff] %v233_v20   ;;  %v245_v23 = vld [vmem:[%s1857_s25 + $0x2b0] sm:$0xff]   ;;  %238 = vst [vmem:[%s1862_s26 + $0xa8] sm:$0xff] %v237_v21   ;;  %v249_v24 = vld [vmem:[%s1857_s25 + $0x2b8] sm:$0xff]  }
  0x1e   : > { %242 = vst [vmem:[%s1862_s26 + $0xb0] sm:$0xff] %v241_v22   ;;  %246 = vst [vmem:[%s1862_s26 + $0xb8] sm:$0xff] %v245_v23   ;;  %v253_v25 = vld [vmem:[%s1857_s25 + $0x2c0] sm:$0xff]   ;;  %v257_v26 = vld [vmem:[%s1857_s25 + $0x2c8] sm:$0xff]  }
  0x1f   : > { %250 = vst [vmem:[%s1862_s26 + $0xc0] sm:$0xff] %v249_v24   ;;  %254 = vst [vmem:[%s1862_s26 + $0xc8] sm:$0xff] %v253_v25   ;;  %v261_v27 = vld [vmem:[%s1857_s25 + $0x2d0] sm:$0xff]  }
  0x20   : > { %258 = vst [vmem:[%s1862_s26 + $0xd0] sm:$0xff] %v257_v26   ;;  %262 = vst [vmem:[%s1862_s26 + $0xd8] sm:$0xff] %v261_v27  }
  0x21 PF: > { %p1336_p5 = scmp.ge.s32.totalorder %s1798_s14, 1  ;;  %p398_p6 = scmp.lt.s32.totalorder %s1798_s14, 5 }
  0x23   : > { %p399_p7 = pnand %p1336_p5, %p398_p6 }
  0x24   : > { %v1743_v28 = vld [vmem:[%s2239_s1] sm:$0xff] (!%p399_p7)   ;;  %v1800_v29 = vmov (!%p399_p7), 0.0   ;;  %v1744_v30 = vld [vmem:[%s2239_s1 + $0x8] sm:$0xff] (!%p399_p7)   ;;  %vm546_vm0 = vcmask (!%p399_p7), 1044480   ;;  %s405_s4 = sand.u32 (!%p399_p7), 1, %s1790_s12   ;;  %v1745_v31 = vld [vmem:[%s2239_s1 + $0x10] sm:$0xff] (!%p399_p7)  }
  0x25   : > { %402 = sbr.rel (%p399_p7) target bundleno = 386 (0x182), region = 69  ;;  %1562 = vmatprep.subr.bf16.mxu0 (!%p399_p7), %v1800_v29  ;;  %1600 = vmatprep.subr.bf16.mxu1 (!%p399_p7), %v1800_v29  ;;  %vm547_vm1 = vcmask (!%p399_p7), 1045504   ;;  %v1801_v32 = vmov (!%p399_p7), 65535   ;;  %vm1802_vm2 = vmmov (!%p399_p7), 0   ;;  %v1746_v34 = vld [vmem:[%s2239_s1 + $0x18] sm:$0xff] (!%p399_p7)   ;;  %vm524_vm3 = vcmask (!%p399_p7), 613376  }
  0x26   : > { %1563 = vmatpush3.bf16.msra.mxu0 (!%p399_p7), %v1743_v28  ;;  %1601 = vmatpush3.bf16.msra.mxu1 (!%p399_p7), %v1743_v28  ;;  %s1715_s7 = smul.u32 (!%p399_p7), 224, %s405_s4  ;;  %v548_v33 = vsel (!%p399_p7), %vm546_vm0, 4294967295, %v1801_v32  ;;  %v1747_v35 = vld [vmem:[%s2239_s1 + $0x20] sm:$0x3f] (!%p399_p7)  }
  0x27   : > { %1564 = vmatprep.subr.bf16.mxu0 (!%p399_p7), %v1800_v29  ;;  %1602 = vmatprep.subr.bf16.mxu1 (!%p399_p7), %v1800_v29  ;;  %v549_v36 = vsel (!%p399_p7), %vm547_vm1, %v548_v33, 0  ;;  %s429_s17 = smul.u32 (!%p399_p7), 14, %s1331_s15 }
  0x28   : > { %1572 = vmatprep.mubr.msk.bf16.mxu0 (!%p399_p7), %vm1802_vm2, %v1800_v29  ;;  %1610 = vmatprep.mubr.msk.bf16.mxu1 (!%p399_p7), %vm1802_vm2, %v1800_v29  ;;  %s1942_s10 = scalar_lea.vmem (!%p399_p7), [#allocation2], %s1715_s7  ;;  %v551_v37 = vand.u32 (!%p399_p7), %v1747_v35, %v549_v36 }
  0x29   : > { %v1748_v38 = vld [vmem:[%s1942_s10] sm:$0xff] (!%p399_p7)   ;;  %v1749_v39 = vld [vmem:[%s1942_s10 + $0x38] sm:$0xff] (!%p399_p7)   ;;  %v1750_v40 = vld [vmem:[%s1942_s10 + $0x8] sm:$0xff] (!%p399_p7)   ;;  %p430_p8 = scmp.lt.s32.totalorder (!%p399_p7), %s429_s17, 55 }
  0x2a   : > { %1565 = vmatpush3.bf16.msra.mxu0 (!%p399_p7), %v1744_v30  ;;  %1603 = vmatpush3.bf16.msra.mxu1 (!%p399_p7), %v1744_v30  ;;  %v1751_v41 = vld [vmem:[%s1942_s10 + $0x40] sm:$0xff] (!%p399_p7)   ;;  %v1752_v42 = vld [vmem:[%s1942_s10 + $0x10] sm:$0xff] (!%p399_p7)   ;;  %v1753_v43 = vld [vmem:[%s1942_s10 + $0x48] sm:$0xff] (!%p399_p7)  }
  0x2b   : > { %1566 = vmatprep.subr.bf16.mxu0 (!%p399_p7), %v1800_v29  ;;  %1604 = vmatprep.subr.bf16.mxu1 (!%p399_p7), %v1800_v29  ;;  %v1754_v44 = vld [vmem:[%s1942_s10 + $0x18] sm:$0xff] (!%p399_p7)   ;;  %v1755_v45 = vld [vmem:[%s1942_s10 + $0x50] sm:$0xff] (!%p399_p7)   ;;  %v1756_v46 = vld [vmem:[%s1942_s10 + $0x20] sm:$0xff] (!%p399_p7)  }
  0x2c   : > { %v1757_v47 = vld [vmem:[%s1942_s10 + $0x58] sm:$0xff]   ;;  %v1758_v48 = vld [vmem:[%s1942_s10 + $0x28] sm:$0xff]   ;;  %v1759_v49 = vld [vmem:[%s1942_s10 + $0x60] sm:$0xff]   ;;  %s2246_s17 = smov (!%p430_p8, %s429_s17), 55 }
  0x2d   : > { %v1760_v50 = vld [vmem:[%s1942_s10 + $0x30] sm:$0xff]   ;;  %v1761_v51 = vld [vmem:[%s1942_s10 + $0x68] sm:$0xff]   ;;  %v1764_v54 = vld [vmem:[%s1942_s10 + $0x78] sm:$0xff]   ;;  %s1337_s14 = sshll.u32 %s2246_s17, 2 }
  0x2e   : > { %1567 = vmatpush3.bf16.msra.mxu0 %v1745_v31  ;;  %1605 = vmatpush3.bf16.msra.mxu1 %v1745_v31  ;;  %v1762_v52 = vld [vmem:[%s1942_s10 + $0x70] sm:$0xff]   ;;  %v1763_v53 = vld [vmem:[%s1942_s10 + $0xa8] sm:$0xff]   ;;  %v1766_v56 = vld [vmem:[%s1942_s10 + $0x80] sm:$0xff]   ;;  %s2171_s22 = scalar_lea.vmem %s2241_s3, %s1337_s14 }
  0x2f   : > { %1568 = vmatprep.subr.bf16.mxu0 %v1800_v29  ;;  %1606 = vmatprep.subr.bf16.mxu1 %v1800_v29  ;;  %v1765_v55 = vld [vmem:[%s1942_s10 + $0xb0] sm:$0xff]   ;;  %v1767_v57 = vld [vmem:[%s1942_s10 + $0xb8] sm:$0xff]   ;;  %v1768_v58 = vld [vmem:[%s1942_s10 + $0x88] sm:$0xff]  }
  0x30   : > { %v1769_v59 = vld [vmem:[%s1942_s10 + $0xc0] sm:$0xff]   ;;  %v1770_v60 = vld [vmem:[%s1942_s10 + $0x90] sm:$0xff]   ;;  %v1771_v61 = vld [vmem:[%s1942_s10 + $0xc8] sm:$0xff]  }
  0x31   : > { %v1772_v62 = vld [vmem:[%s1942_s10 + $0x98] sm:$0xff]   ;;  %v1773_v63 = vld [vmem:[%s1942_s10 + $0xd0] sm:$0xff]   ;;  %v1774_v0 = vld [vmem:[%s1942_s10 + $0xa0] sm:$0xff]  }
  0x32   : > { %1569 = vmatpush3.bf16.msra.mxu0 %v1746_v34  ;;  %1607 = vmatpush3.bf16.msra.mxu1 %v1746_v34  ;;  %v1775_v1 = vld [vmem:[%s1942_s10 + $0xd8] sm:$0xff]  }
  0x33   : > { %1570 = vmatprep.subr.bf16.mxu0 %v1800_v29  ;;  %1608 = vmatprep.subr.bf16.mxu1 %v1800_v29 }
  0x36   : > { %1571 = vmatpush3.bf16.msra.mxu0 %v551_v37  ;;  %1609 = vmatpush3.bf16.msra.mxu1 %v551_v37 }
  0x37   : > { %1638 = vmatprep.subr.bf16.mxu0 %v1800_v29  ;;  %1676 = vmatprep.subr.bf16.mxu1 %v1800_v29 }
  0x39   : > { %1573 = vmatmul.mubr.msk.bf16.vlgmr.msra.gmra.mrb[0].mxu0 %vm524_vm3, %v1748_v38  ;;  %1611 = vmatmul.mubr.msk.bf16.vlgmr.msra.gmra.mrb[0].mxu1 %vm524_vm3, %v1749_v39 }
  0x3a   : > { %1639 = vmatpush3.bf16.msra.mxu0 %v1743_v28  ;;  %1677 = vmatpush3.bf16.msra.mxu1 %v1743_v28 }
  0x3b   : > { %1576 = vmatprep.mubr.msk.bf16.mxu0 %vm1802_vm2, %v1800_v29  ;;  %1614 = vmatprep.mubr.msk.bf16.mxu1 %vm1802_vm2, %v1800_v29 }
  0x3c   : > { %1640 = vmatprep.subr.bf16.mxu0 %v1800_v29  ;;  %1678 = vmatprep.subr.bf16.mxu1 %v1800_v29 }
  0x3e   : > { %1641 = vmatpush3.bf16.msra.mxu0 %v1744_v30  ;;  %1679 = vmatpush3.bf16.msra.mxu1 %v1744_v30 }
  0x3f   : > { %1642 = vmatprep.subr.bf16.mxu0 %v1800_v29  ;;  %1680 = vmatprep.subr.bf16.mxu1 %v1800_v29 }
  0x41   : > { %1577 = vmatmul.mubr.msk.bf16.gmra.mrb[4].mxu0 %vm524_vm3, %v1750_v40  ;;  %1615 = vmatmul.mubr.msk.bf16.gmra.mrb[4].mxu1 %vm524_vm3, %v1751_v41 }
  0x42   : > { %1580 = vmatprep.mubr.msk.bf16.mxu0 %vm1802_vm2, %v1800_v29  ;;  %1618 = vmatprep.mubr.msk.bf16.mxu1 %vm1802_vm2, %v1800_v29 }
  0x43   : > { %1643 = vmatpush3.bf16.msra.mxu0 %v1745_v31  ;;  %1681 = vmatpush3.bf16.msra.mxu1 %v1745_v31 }
  0x44   : > { %1644 = vmatprep.subr.bf16.mxu0 %v1800_v29  ;;  %1682 = vmatprep.subr.bf16.mxu1 %v1800_v29 }
  0x47   : > { %1645 = vmatpush3.bf16.msra.mxu0 %v1746_v34  ;;  %1683 = vmatpush3.bf16.msra.mxu1 %v1746_v34 }
  0x48   : > { %1646 = vmatprep.subr.bf16.mxu0 %v1800_v29  ;;  %1684 = vmatprep.subr.bf16.mxu1 %v1800_v29 }
  0x49   : > { %1581 = vmatmul.mubr.msk.bf16.gmra.mrb[8].mxu0 %vm524_vm3, %v1752_v42  ;;  %1619 = vmatmul.mubr.msk.bf16.gmra.mrb[8].mxu1 %vm524_vm3, %v1753_v43 }
  0x4a   : > { %1584 = vmatprep.mubr.msk.bf16.mxu0 %vm1802_vm2, %v1800_v29  ;;  %1622 = vmatprep.mubr.msk.bf16.mxu1 %vm1802_vm2, %v1800_v29 }
  0x4b   : > { %1647 = vmatpush3.bf16.msra.mxu0 %v551_v37  ;;  %1685 = vmatpush3.bf16.msra.mxu1 %v551_v37 }
  0x51   : > { %1585 = vmatmul.mubr.msk.bf16.gmra.mrb[12].mxu0 %vm524_vm3, %v1754_v44  ;;  %1623 = vmatmul.mubr.msk.bf16.gmra.mrb[12].mxu1 %vm524_vm3, %v1755_v45 }
  0x52   : > { %1588 = vmatprep.mubr.msk.bf16.mxu0 %vm1802_vm2, %v1800_v29  ;;  %1626 = vmatprep.mubr.msk.bf16.mxu1 %vm1802_vm2, %v1800_v29 }
  0x59   : > { %1589 = vmatmul.mubr.msk.bf16.gmra.mrb[16].mxu0 %vm524_vm3, %v1756_v46  ;;  %1627 = vmatmul.mubr.msk.bf16.gmra.mrb[16].mxu1 %vm524_vm3, %v1757_v47 }
  0x5a   : > { %1592 = vmatprep.mubr.msk.bf16.mxu0 %vm1802_vm2, %v1800_v29  ;;  %1630 = vmatprep.mubr.msk.bf16.mxu1 %vm1802_vm2, %v1800_v29 }
  0x61   : > { %1593 = vmatmul.mubr.msk.bf16.gmra.mrb[20].mxu0 %vm524_vm3, %v1758_v48  ;;  %1631 = vmatmul.mubr.msk.bf16.gmra.mrb[20].mxu1 %vm524_vm3, %v1759_v49 }
  0x62   : > { %1596 = vmatprep.mubr.msk.bf16.mxu0 %vm1802_vm2, %v1800_v29  ;;  %1634 = vmatprep.mubr.msk.bf16.mxu1 %vm1802_vm2, %v1800_v29 }
  0x69   : > { %1597 = vmatmul.mubr.msk.bf16.gmra.mrb[24].mxu0 %vm524_vm3, %v1760_v50  ;;  %1635 = vmatmul.mubr.msk.bf16.gmra.mrb[24].mxu1 %vm524_vm3, %v1761_v51 }
  0x6a   : > { %1648 = vmatprep.mubr.msk.bf16.mxu0 %vm1802_vm2, %v1800_v29  ;;  %1686 = vmatprep.mubr.msk.bf16.mxu1 %vm1802_vm2, %v1800_v29 }
  0x71   : > { %1649 = vmatmul.mubr.msk.bf16.vlgmr.msra.gmra.mrb[28].mxu0 %vm524_vm3, %v1762_v52  ;;  %1687 = vmatmul.mubr.msk.bf16.vlgmr.msra.gmra.mrb[28].mxu1 %vm524_vm3, %v1763_v53 }
  0x72   : > { %1652 = vmatprep.mubr.msk.bf16.mxu0 %vm1802_vm2, %v1800_v29  ;;  %1690 = vmatprep.mubr.msk.bf16.mxu1 %vm1802_vm2, %v1800_v29 }
  0x79   : > { %1653 = vmatmul.mubr.msk.bf16.gmra.mrb[32].mxu0 %vm524_vm3, %v1764_v54  ;;  %1691 = vmatmul.mubr.msk.bf16.gmra.mrb[32].mxu1 %vm524_vm3, %v1765_v55 }
  0x7a   : > { %1656 = vmatprep.mubr.msk.bf16.mxu0 %vm1802_vm2, %v1800_v29  ;;  %1694 = vmatprep.mubr.msk.bf16.mxu1 %vm1802_vm2, %v1800_v29 }
  0x81   : > { %1657 = vmatmul.mubr.msk.bf16.gmra.mrb[36].mxu0 %vm524_vm3, %v1766_v56  ;;  %1695 = vmatmul.mubr.msk.bf16.gmra.mrb[36].mxu1 %vm524_vm3, %v1767_v57 }
  0x82   : > { %1660 = vmatprep.mubr.msk.bf16.mxu0 %vm1802_vm2, %v1800_v29  ;;  %1698 = vmatprep.mubr.msk.bf16.mxu1 %vm1802_vm2, %v1800_v29 }
  0x89   : > { %1661 = vmatmul.mubr.msk.bf16.gmra.mrb[40].mxu0 %vm524_vm3, %v1768_v58  ;;  %1699 = vmatmul.mubr.msk.bf16.gmra.mrb[40].mxu1 %vm524_vm3, %v1769_v59 }
  0x8a   : > { %1664 = vmatprep.mubr.msk.bf16.mxu0 %vm1802_vm2, %v1800_v29  ;;  %1702 = vmatprep.mubr.msk.bf16.mxu1 %vm1802_vm2, %v1800_v29 }
  0x91   : > { %1665 = vmatmul.mubr.msk.bf16.gmra.mrb[44].mxu0 %vm524_vm3, %v1770_v60  ;;  %1703 = vmatmul.mubr.msk.bf16.gmra.mrb[44].mxu1 %vm524_vm3, %v1771_v61 }
  0x92   : > { %1668 = vmatprep.mubr.msk.bf16.mxu0 %vm1802_vm2, %v1800_v29  ;;  %1706 = vmatprep.mubr.msk.bf16.mxu1 %vm1802_vm2, %v1800_v29 }
  0x99   : > { %1669 = vmatmul.mubr.msk.bf16.gmra.mrb[48].mxu0 %vm524_vm3, %v1772_v62  ;;  %1707 = vmatmul.mubr.msk.bf16.gmra.mrb[48].mxu1 %vm524_vm3, %v1773_v63 }
  0x9a   : > { %1672 = vmatprep.mubr.msk.bf16.mxu0 %vm1802_vm2, %v1800_v29  ;;  %1710 = vmatprep.mubr.msk.bf16.mxu1 %vm1802_vm2, %v1800_v29 }
  0xa1   : > { %1673 = vmatmul.mubr.msk.bf16.gmra.mrb[52].mxu0 %vm524_vm3, %v1774_v0  ;;  %1711 = vmatmul.mubr.msk.bf16.gmra.mrb[52].mxu1 %vm524_vm3, %v1775_v1 }
 0x10c   : > { %v2069_v2 = vpop.f32.mrb[0].mxu0  ;;  %v2071_v3 = vpop.f32.mrb[0].mxu1 }
 0x10d   : > { %v1122_v4 = vmax.f32 %v2069_v2, %v2071_v3  ;;  %v1574_v5 = vpop.f32.mrb[1].mxu0  ;;  %v1612_v6 = vpop.f32.mrb[1].mxu1 }
 0x10e   : > { %v2075_v7 = vpop.f32.mrb[2].mxu0  ;;  %v2077_v8 = vpop.f32.mrb[2].mxu1 }
 0x10f   : > { %v1123_v9 = vmax.f32 %v2075_v7, %v2077_v8  ;;  %v1575_v10 = vpop.f32.mrb[3].mxu0  ;;  %v1613_v11 = vpop.f32.mrb[3].mxu1 }
 0x114   : > { %v2081_v12 = vpop.f32.mrb[4].mxu0  ;;  %v2083_v13 = vpop.f32.mrb[4].mxu1 }
 0x115   : > { %v1124_v14 = vmax.f32 %v2081_v12, %v2083_v13  ;;  %v1578_v15 = vpop.f32.mrb[5].mxu0  ;;  %v1616_v16 = vpop.f32.mrb[5].mxu1 }
 0x116   : > { %v2087_v17 = vpop.f32.mrb[6].mxu0  ;;  %v2089_v18 = vpop.f32.mrb[6].mxu1 }
 0x117   : > { %v1125_v19 = vmax.f32 %v2087_v17, %v2089_v18  ;;  %v1579_v20 = vpop.f32.mrb[7].mxu0  ;;  %v1617_v21 = vpop.f32.mrb[7].mxu1 }
 0x11c   : > { %v2093_v22 = vpop.f32.mrb[8].mxu0  ;;  %v2095_v23 = vpop.f32.mrb[8].mxu1 }
 0x11d   : > { %v1126_v24 = vmax.f32 %v2093_v22, %v2095_v23  ;;  %v1582_v25 = vpop.f32.mrb[9].mxu0  ;;  %v1620_v26 = vpop.f32.mrb[9].mxu1 }
 0x11e   : > { %v2099_v27 = vpop.f32.mrb[10].mxu0  ;;  %v2101_v28 = vpop.f32.mrb[10].mxu1 }
 0x11f   : > { %v1127_v29 = vmax.f32 %v2099_v27, %v2101_v28  ;;  %v1583_v30 = vpop.f32.mrb[11].mxu0  ;;  %v1621_v31 = vpop.f32.mrb[11].mxu1 }
 0x120   : > { %v2158_v31 = vld [vmem:[%s2240_s2] ss:$0 sm:$0xff] }
 0x124   : > { %v2105_v32 = vpop.f32.mrb[12].mxu0  ;;  %v2107_v33 = vpop.f32.mrb[12].mxu1 }
 0x125   : > { %v1128_v34 = vmax.f32 %v2105_v32, %v2107_v33  ;;  %v1586_v35 = vpop.f32.mrb[13].mxu0  ;;  %v1624_v36 = vpop.f32.mrb[13].mxu1 }
 0x126   : > { %v2111_v37 = vpop.f32.mrb[14].mxu0  ;;  %v2113_v38 = vpop.f32.mrb[14].mxu1 }
 0x127   : > { %v1129_v39 = vmax.f32 %v2111_v37, %v2113_v38  ;;  %v1587_v40 = vpop.f32.mrb[15].mxu0  ;;  %v1625_v41 = vpop.f32.mrb[15].mxu1 }
 0x12c   : > { %v2117_v42 = vpop.f32.mrb[16].mxu0  ;;  %v2119_v43 = vpop.f32.mrb[16].mxu1 }
 0x12d   : > { %v1130_v44 = vmax.f32 %v2117_v42, %v2119_v43  ;;  %v1590_v45 = vpop.f32.mrb[17].mxu0  ;;  %v1628_v46 = vpop.f32.mrb[17].mxu1 }
 0x12e   : > { %v2123_v47 = vpop.f32.mrb[18].mxu0  ;;  %v2125_v48 = vpop.f32.mrb[18].mxu1 }
 0x12f   : > { %v1131_v49 = vmax.f32 %v2123_v47, %v2125_v48  ;;  %v1591_v50 = vpop.f32.mrb[19].mxu0  ;;  %v1629_v51 = vpop.f32.mrb[19].mxu1 }
 0x134   : > { %v2129_v52 = vpop.f32.mrb[20].mxu0  ;;  %v2131_v53 = vpop.f32.mrb[20].mxu1 }
 0x135   : > { %v1132_v54 = vmax.f32 %v2129_v52, %v2131_v53  ;;  %v1594_v55 = vpop.f32.mrb[21].mxu0  ;;  %v1632_v56 = vpop.f32.mrb[21].mxu1 }
 0x136   : > { %v2135_v57 = vpop.f32.mrb[22].mxu0  ;;  %v2137_v58 = vpop.f32.mrb[22].mxu1 }
 0x137   : > { %v1133_v59 = vmax.f32 %v2135_v57, %v2137_v58  ;;  %v1595_v60 = vpop.f32.mrb[23].mxu0  ;;  %v1633_v61 = vpop.f32.mrb[23].mxu1 }
 0x13c   : > { %v2141_v62 = vpop.f32.mrb[24].mxu0  ;;  %v2143_v63 = vpop.f32.mrb[24].mxu1 }
 0x13d   : > { %v1134_v0 = vmax.f32 %v2141_v62, %v2143_v63  ;;  %v1598_v1 = vpop.f32.mrb[25].mxu0  ;;  %v1636_v5 = vpop.f32.mrb[25].mxu1 }
 0x13e   : > { %v2147_v6 = vpop.f32.mrb[26].mxu0  ;;  %v2149_v10 = vpop.f32.mrb[26].mxu1 }
 0x13f   : > { %v1135_v11 = vmax.f32 %v2147_v6, %v2149_v10  ;;  %v1599_v15 = vpop.f32.mrb[27].mxu0  ;;  %v1637_v16 = vpop.f32.mrb[27].mxu1 }
 0x144   : > { %v907_v20 = vpop.f32.mrb[28].mxu0  ;;  %v1067_v21 = vpop.f32.mrb[28].mxu1 }
 0x145   : > { %v1136_v25 = vmax.f32 %v907_v20, %v1067_v21  ;;  %v1650_v26 = vpop.f32.mrb[29].mxu0  ;;  %v1688_v30 = vpop.f32.mrb[29].mxu1 }
 0x146   : > { %v910_v35 = vpop.f32.mrb[30].mxu0  ;;  %v1070_v36 = vpop.f32.mrb[30].mxu1 }
 0x147   : > { %v1150_v40 = vmax.f32 %v1122_v4, %v1136_v25  ;;  %v1137_v41 = vmax.f32 %v910_v35, %v1070_v36  ;;  %v1651_v45 = vpop.f32.mrb[31].mxu0  ;;  %v1689_v46 = vpop.f32.mrb[31].mxu1 }
 0x149   : > { %v1171_v50 = vadd.f32 %v2158_v31, %v1150_v40  ;;  %v1151_v51 = vmax.f32 %v1123_v9, %v1137_v41 }
 0x14b   : > { %v1172_v55 = vadd.f32 %v2158_v31, %v1151_v51  ;;  %v1185_v61 = vmax.f32 %v1171_v50, 0.0 }
 0x14c   : > { %v915_v56 = vpop.f32.mrb[32].mxu0  ;;  %v1075_v60 = vpop.f32.mrb[32].mxu1 }
 0x14d   : > { %v1186_v1 = vmax.f32 %v1172_v55, 0.0  ;;  %v1138_v5 = vmax.f32 %v915_v56, %v1075_v60  ;;  %v1654_v2 = vpop.f32.mrb[33].mxu0  ;;  %v1692_v3 = vpop.f32.mrb[33].mxu1 }
 0x14e   : > { %v918_v4 = vpop.f32.mrb[34].mxu0  ;;  %v1078_v15 = vpop.f32.mrb[34].mxu1 }
 0x14f   : > { %v1476_v7 = vpack.c.bf16 %v1186_v1, %v1185_v61  ;;  %v1152_v8 = vmax.f32 %v1124_v14, %v1138_v5  ;;  %v1139_v9 = vmax.f32 %v918_v4, %v1078_v15  ;;  %v1655_v16 = vpop.f32.mrb[35].mxu0  ;;  %v1693_v20 = vpop.f32.mrb[35].mxu1 }
 0x151   : > { %1477 = vst [vmem:[%s2171_s22] sm:$0xff] %v1476_v7   ;;  %v1173_v21 = vadd.f32 %v2158_v31, %v1152_v8  ;;  %v1153_v25 = vmax.f32 %v1125_v19, %v1139_v9 }
 0x153   : > { %v1174_v26 = vadd.f32 %v2158_v31, %v1153_v25  ;;  %v1187_v36 = vmax.f32 %v1173_v21, 0.0 }
 0x154   : > { %v923_v30 = vpop.f32.mrb[36].mxu0  ;;  %v1083_v35 = vpop.f32.mrb[36].mxu1 }
 0x155   : > { %v1188_v40 = vmax.f32 %v1174_v26, 0.0  ;;  %v1140_v41 = vmax.f32 %v923_v30, %v1083_v35  ;;  %v1658_v12 = vpop.f32.mrb[37].mxu0  ;;  %v1696_v13 = vpop.f32.mrb[37].mxu1 }
 0x156   : > { %v926_v14 = vpop.f32.mrb[38].mxu0  ;;  %v1086_v45 = vpop.f32.mrb[38].mxu1 }
 0x157   : > { %v1481_v46 = vpack.c.bf16 %v1188_v40, %v1187_v36  ;;  %v1154_v50 = vmax.f32 %v1126_v24, %v1140_v41  ;;  %v1141_v51 = vmax.f32 %v926_v14, %v1086_v45  ;;  %v1659_v17 = vpop.f32.mrb[39].mxu0  ;;  %v1697_v18 = vpop.f32.mrb[39].mxu1 }
 0x159   : > { %1508 = vst [vmem:[%s2171_s22 + $0x8] sm:$0xff] %v1481_v46   ;;  %v1175_v19 = vadd.f32 %v2158_v31, %v1154_v50  ;;  %v1155_v55 = vmax.f32 %v1127_v29, %v1141_v51 }
 0x15b   : > { %v1176_v56 = vadd.f32 %v2158_v31, %v1155_v55  ;;  %v1189_v1 = vmax.f32 %v1175_v19, 0.0 }
 0x15c   : > { %v931_v60 = vpop.f32.mrb[40].mxu0  ;;  %v1091_v61 = vpop.f32.mrb[40].mxu1 }
 0x15d   : > { %v1190_v5 = vmax.f32 %v1176_v56, 0.0  ;;  %v1142_v2 = vmax.f32 %v931_v60, %v1091_v61  ;;  %v1662_v22 = vpop.f32.mrb[41].mxu0  ;;  %v1700_v23 = vpop.f32.mrb[41].mxu1 }
 0x15e   : > { %v934_v24 = vpop.f32.mrb[42].mxu0  ;;  %v1094_v3 = vpop.f32.mrb[42].mxu1 }
 0x15f   : > { %v1486_v4 = vpack.c.bf16 %v1190_v5, %v1189_v1  ;;  %v1156_v15 = vmax.f32 %v1128_v34, %v1142_v2  ;;  %v1143_v7 = vmax.f32 %v934_v24, %v1094_v3  ;;  %v1663_v27 = vpop.f32.mrb[43].mxu0  ;;  %v1701_v28 = vpop.f32.mrb[43].mxu1 }
 0x161   : > { %1509 = vst [vmem:[%s2171_s22 + $0x10] sm:$0xff] %v1486_v4   ;;  %v1177_v29 = vadd.f32 %v2158_v31, %v1156_v15  ;;  %v1157_v8 = vmax.f32 %v1129_v39, %v1143_v7 }
 0x163   : > { %v1178_v9 = vadd.f32 %v2158_v31, %v1157_v8  ;;  %v1191_v21 = vmax.f32 %v1177_v29, 0.0 }
 0x164   : > { %v939_v16 = vpop.f32.mrb[44].mxu0  ;;  %v1099_v20 = vpop.f32.mrb[44].mxu1 }
 0x165   : > { %v1192_v25 = vmax.f32 %v1178_v9, 0.0  ;;  %v1144_v26 = vmax.f32 %v939_v16, %v1099_v20  ;;  %v1666_v32 = vpop.f32.mrb[45].mxu0  ;;  %v1704_v33 = vpop.f32.mrb[45].mxu1 }
 0x166   : > { %v942_v34 = vpop.f32.mrb[46].mxu0  ;;  %v1102_v30 = vpop.f32.mrb[46].mxu1 }
 0x167   : > { %v1491_v35 = vpack.c.bf16 %v1192_v25, %v1191_v21  ;;  %v1158_v36 = vmax.f32 %v1130_v44, %v1144_v26  ;;  %v1145_v40 = vmax.f32 %v942_v34, %v1102_v30  ;;  %v1667_v37 = vpop.f32.mrb[47].mxu0  ;;  %v1705_v38 = vpop.f32.mrb[47].mxu1 }
 0x169   : > { %1510 = vst [vmem:[%s2171_s22 + $0x18] sm:$0xff] %v1491_v35   ;;  %v1179_v39 = vadd.f32 %v2158_v31, %v1158_v36  ;;  %v1159_v41 = vmax.f32 %v1131_v49, %v1145_v40 }
 0x16b   : > { %v1180_v12 = vadd.f32 %v2158_v31, %v1159_v41  ;;  %v1193_v45 = vmax.f32 %v1179_v39, 0.0 }
 0x16c   : > { %v947_v13 = vpop.f32.mrb[48].mxu0  ;;  %v1107_v14 = vpop.f32.mrb[48].mxu1 }
 0x16d   : > { %v1194_v46 = vmax.f32 %v1180_v12, 0.0  ;;  %v1146_v50 = vmax.f32 %v947_v13, %v1107_v14  ;;  %v1670_v42 = vpop.f32.mrb[49].mxu0  ;;  %v1708_v43 = vpop.f32.mrb[49].mxu1 }
 0x16e   : > { %v950_v44 = vpop.f32.mrb[50].mxu0  ;;  %v1110_v51 = vpop.f32.mrb[50].mxu1 }
 0x16f   : > { %v1496_v17 = vpack.c.bf16 %v1194_v46, %v1193_v45  ;;  %v1160_v18 = vmax.f32 %v1132_v54, %v1146_v50  ;;  %v1147_v19 = vmax.f32 %v950_v44, %v1110_v51  ;;  %v1671_v47 = vpop.f32.mrb[51].mxu0  ;;  %v1709_v48 = vpop.f32.mrb[51].mxu1 }
 0x171   : > { %1511 = vst [vmem:[%s2171_s22 + $0x20] sm:$0xff] %v1496_v17   ;;  %v1181_v49 = vadd.f32 %v2158_v31, %v1160_v18  ;;  %v1161_v55 = vmax.f32 %v1133_v59, %v1147_v19 }
 0x173   : > { %v1182_v56 = vadd.f32 %v2158_v31, %v1161_v55  ;;  %v1195_v1 = vmax.f32 %v1181_v49, 0.0 }
 0x174   : > { %v955_v60 = vpop.f32.mrb[52].mxu0  ;;  %v1115_v61 = vpop.f32.mrb[52].mxu1 }
 0x175   : > { %v1196_v5 = vmax.f32 %v1182_v56, 0.0  ;;  %v1148_v2 = vmax.f32 %v955_v60, %v1115_v61  ;;  %v1674_v52 = vpop.f32.mrb[53].mxu0  ;;  %v1712_v53 = vpop.f32.mrb[53].mxu1 }
 0x176   : > { %v958_v54 = vpop.f32.mrb[54].mxu0  ;;  %v1118_v22 = vpop.f32.mrb[54].mxu1 }
 0x177   : > { %v1501_v23 = vpack.c.bf16 %v1196_v5, %v1195_v1  ;;  %v1162_v24 = vmax.f32 %v1134_v0, %v1148_v2  ;;  %v1149_v57 = vmax.f32 %v958_v54, %v1118_v22  ;;  %v1675_v58 = vpop.f32.mrb[55].mxu0  ;;  %v1713_v59 = vpop.f32.mrb[55].mxu1 }
 0x179   : > { %1512 = vst [vmem:[%s2171_s22 + $0x28] sm:$0xff] %v1501_v23   ;;  %v1183_v3 = vadd.f32 %v2158_v31, %v1162_v24  ;;  %v1163_v4 = vmax.f32 %v1135_v11, %v1149_v57 }
 0x17b   : > { %v1184_v15 = vadd.f32 %v2158_v31, %v1163_v4  ;;  %v1197_v7 = vmax.f32 %v1183_v3, 0.0 }
 0x17d   : > { %v1198_v27 = vmax.f32 %v1184_v15, 0.0 }
 0x17f   : > { %v1506_v28 = vpack.c.bf16 %v1198_v27, %v1197_v7 }
 0x181   : > { %1513 = vst [vmem:[%s2171_s22 + $0x30] sm:$0xff] %v1506_v28  }
 0x182 PF: > { %p10_p9 = scmp.ge.s32.totalorder %s1840_s16, 6   ;;  %s2242_s12 = smov %s1794_s13 }
 0x183   : > { %s2243_s13 = smov %s1849_s19  ;;  %s2244_s14 = smov %s1840_s16 }
 0x184   :  { %12 = sbr.rel (!%p10_p9) target bundleno = 2 (0x2), region = 111 }

// kernel: simple_cnn_forward.4
= control target key start
LH: loop header
LB: loop body
LE: loop exit
PB: predicated region body
PF: predicated region fallthrough
CT: control target
= control target key end

     0   :  { %s777_s12 = smov 0   ;;  %s779_s13 = smov 0   ;;  %s940_s0 = inlined_call_operand.vmem [shape: bf16[4,64,150], index: 0, kind: input, shape index: {}]   ;;  %s941_s1 = inlined_call_operand.vmem [shape: bf16[150,128], index: 1, kind: input, shape index: {}]   ;;  %s942_s2 = inlined_call_operand.vmem [shape: f32[1,128], index: 2, kind: input, shape index: {}]   ;;  %s943_s3 = inlined_call_operand.vmem [shape: bf16[64,128], index: 3, kind: output, shape index: {}]  }
   0x1   :  { %s781_s14 = smov 0  }
   0x2 LB: > { %s631_s15 = sadd.s32 4294967295, %s754_s14   ;;  %s794_s16 = sadd.s32 1, %s754_s14   ;;  %s754_s14 = sphi %s781_s14, %s946_s14   ;;  %s750_s13 = sphi %s779_s13, %s945_s13   ;;  %s746_s12 = sphi %s777_s12, %s944_s12  }
   0x3   : > { %s17_s17 = ssub.s32 %s754_s14, %s794_s16  ;;  %s20_s18 = sadd.s32 1, %s750_s13 }
   0x4   : > { %p18_p0 = scmp.eq.s32.totalorder %s17_s17, 0  ;;  %p27_p1 = scmp.ne.s32.totalorder %s750_s13, %s746_s12 }
   0x5   : > { %p28_p2 = scmp.eq.s32.totalorder %s754_s14, 0  ;;  %p634_p4 = scmp.ge.s32.totalorder %s754_s14, 4 }
   0x6   : > { %s803_s19 = scalar_select %p18_p0, %s750_s13, %s20_s18  }
   0x7   : > { %p29_p3 = por %p28_p2, %p27_p1  ;;  %127 = sbr.rel (%p634_p4) target bundleno = 22 (0x16), region = 24 }
   0xe   : > { %130 = sbr.rel (!%p29_p3) target bundleno = 22 (0x16), region = 28  ;;  %s132_s20 = sand.u32 (%p29_p3), 1, %s750_s13  }
   0xf   : > { %s677_s21 = sshll.u32 (%p29_p3), %s754_s14, 4  ;;  %s635_s22 = sshll.u32 (%p29_p3), %s132_s20, 6 }
  0x10   : > { %s138_s25 = scalar_lea.vmem (%p29_p3), %s940_s0, %s677_s21  ;;  %s134_s26 = scalar_lea.vmem (%p29_p3), [#allocation2], %s635_s22 }
  0x11   : > { %v180_v0 = vld [vmem:[%s138_s25] sm:$0xff] (%p29_p3)  ;;  %v182_v1 = vld [vmem:[%s138_s25 + $0x8] sm:$0xff] (%p29_p3) }
  0x12   : > { %v184_v2 = vld [vmem:[%s138_s25 + $0x40] sm:$0xff] (%p29_p3)  ;;  %181 = vst [vmem:[%s134_s26] sm:$0xff] (%p29_p3), %v180_v0  ;;  %183 = vst [vmem:[%s134_s26 + $0x8] sm:$0xff] (%p29_p3), %v182_v1  ;;  %v186_v3 = vld [vmem:[%s138_s25 + $0x48] sm:$0xff] (%p29_p3) }
  0x13   : > { %185 = vst [vmem:[%s134_s26 + $0x10] sm:$0xff] (%p29_p3), %v184_v2  ;;  %v188_v4 = vld [vmem:[%s138_s25 + $0x80] sm:$0xff] (%p29_p3)  ;;  %v190_v5 = vld [vmem:[%s138_s25 + $0x88] sm:$0xff] (%p29_p3)  ;;  %187 = vst [vmem:[%s134_s26 + $0x18] sm:$0xff] (%p29_p3), %v186_v3 }
  0x14   : > { %189 = vst [vmem:[%s134_s26 + $0x20] sm:$0xff] (%p29_p3), %v188_v4  ;;  %191 = vst [vmem:[%s134_s26 + $0x28] sm:$0xff] (%p29_p3), %v190_v5  ;;  %v192_v6 = vld [vmem:[%s138_s25 + $0xc0] sm:$0xff] (%p29_p3)  ;;  %v194_v7 = vld [vmem:[%s138_s25 + $0xc8] sm:$0xff] (%p29_p3) }
  0x15   : > { %193 = vst [vmem:[%s134_s26 + $0x30] sm:$0xff] %v192_v6  ;;  %195 = vst [vmem:[%s134_s26 + $0x38] sm:$0xff] %v194_v7 }
  0x16 PF: > { %p639_p5 = scmp.ge.s32.totalorder %s754_s14, 1  ;;  %p200_p6 = scmp.lt.s32.totalorder %s754_s14, 5 }
  0x18   : > { %p201_p7 = pnand %p639_p5, %p200_p6 }
  0x19   : > { %v816_v8 = vld [vmem:[%s941_s1] sm:$0xff] (!%p201_p7)   ;;  %v756_v9 = vmov (!%p201_p7), 0   ;;  %v825_v10 = vld [vmem:[%s941_s1 + $0x8] sm:$0xff] (!%p201_p7)   ;;  %s207_s4 = sand.u32 (!%p201_p7), 1, %s746_s12   ;;  %v835_v11 = vld [vmem:[%s941_s1 + $0x10] sm:$0xff] (!%p201_p7)   ;;  %vm325_vm0 = vcmask (!%p201_p7), 179200  }
  0x1a   : > { %204 = sbr.rel (%p201_p7) target bundleno = 331 (0x14b), region = 66  ;;  %333 = vmatprep.subr.bf16.mxu0 (!%p201_p7), %v756_v9  ;;  %389 = vmatprep.subr.bf16.mxu1 (!%p201_p7), %v756_v9  ;;  %s640_s5 = sshll.u32 (!%p201_p7), %s207_s4, 6  ;;  %v846_v12 = vld [vmem:[%s941_s1 + $0x18] sm:$0xff] (!%p201_p7)   ;;  %v714_v15 = vld [vmem:[%s941_s1 + $0x20] sm:$0xff] (!%p201_p7)   ;;  %v715_v16 = vld [vmem:[%s941_s1 + $0x28] sm:$0xff] (!%p201_p7)   ;;  %vm329_vm1 = vcmask (!%p201_p7), 1042432  }
  0x1b   : > { %334 = vmatpush1.bf16.msra.mxu0 (!%p201_p7), %v816_v8  ;;  %390 = vmatpush1.bf16.msra.mxu1 (!%p201_p7), %v816_v8  ;;  %s839_s8 = scalar_lea.vmem (!%p201_p7), [#allocation2], %s640_s5  ;;  %v716_v17 = vld [vmem:[%s941_s1 + $0x30] sm:$0xff] (!%p201_p7)   ;;  %v717_v18 = vld [vmem:[%s941_s1 + $0x38] sm:$0xff] (!%p201_p7)   ;;  %v718_v19 = vld [vmem:[%s941_s1 + $0x40] sm:$0xff] (!%p201_p7)   ;;  %s641_s28 = sshll.u32 (!%p201_p7), %s631_s15, 1 }
  0x1c   : > { %335 = vmatprep.subr.bf16.mxu0 (!%p201_p7), %v756_v9  ;;  %391 = vmatprep.subr.bf16.mxu1 (!%p201_p7), %v756_v9  ;;  %v722_v13 = vld [vmem:[%s839_s8 + $0x4] ss:$8 sps:$4 sm:$0xff] (!%p201_p7)   ;;  %v725_v14 = vld [vmem:[%s839_s8 + $0x14] ss:$8 sps:$4 sm:$0xff] (!%p201_p7)   ;;  %v720_v22 = vld [vmem:[%s839_s8] ss:$8 sps:$4 sm:$0xff] (!%p201_p7)  }
  0x1d   : > { %655 = vmatprep.mubr.msk.bf16.mxu0 (!%p201_p7), %vm325_vm0, %v722_v13  ;;  %660 = vmatprep.mubr.msk.bf16.mxu1 (!%p201_p7), %vm325_vm0, %v725_v14  ;;  %v719_v20 = vld [vmem:[%s941_s1 + $0x48] ss:$0 sps:$4 sm:$0x77] (!%p201_p7)   ;;  %v723_v23 = vld [vmem:[%s839_s8 + $0x10] ss:$8 sps:$4 sm:$0xff] (!%p201_p7)   ;;  %p232_p8 = scmp.lt.s32.totalorder (!%p201_p7), %s641_s28, 7 }
  0x1e   : > { %v331_v21 = vsel (!%p201_p7), %vm329_vm1, %v719_v20, 0  ;;  %v726_v24 = vld [vmem:[%s839_s8 + $0x24] ss:$8 sps:$4 sm:$0xff] (!%p201_p7)   ;;  %v728_v25 = vld [vmem:[%s839_s8 + $0x34] ss:$8 sps:$4 sm:$0xff] (!%p201_p7)  }
  0x1f   : > { %336 = vmatpush1.bf16.msra.mxu0 (!%p201_p7), %v825_v10  ;;  %392 = vmatpush1.bf16.msra.mxu1 (!%p201_p7), %v825_v10  ;;  %v730_v26 = vld [vmem:[%s839_s8 + $0x20] ss:$8 sps:$4 sm:$0xff] (!%p201_p7)   ;;  %v731_v27 = vld [vmem:[%s839_s8 + $0x30] ss:$8 sps:$4 sm:$0xff] (!%p201_p7)  }
  0x20   : > { %337 = vmatprep.subr.bf16.mxu0 (!%p201_p7), %v756_v9  ;;  %393 = vmatprep.subr.bf16.mxu1 (!%p201_p7), %v756_v9  ;;  %v671_v43 = vld [vmem:[%s942_s2] ss:$0 sm:$0xff] (!%p201_p7) }
  0x21   : > { %s948_s28 = smov (!%p232_p8, %s641_s28), 7 }
  0x22   : > { %s642_s14 = sshll.u32 %s948_s28, 2 }
  0x23   : > { %338 = vmatpush1.bf16.msra.mxu0 %v835_v11  ;;  %394 = vmatpush1.bf16.msra.mxu1 %v835_v11  ;;  %s235_s5 = scalar_lea.vmem %s943_s3, %s642_s14 }
  0x24   : > { %339 = vmatprep.subr.bf16.mxu0 %v756_v9  ;;  %395 = vmatprep.subr.bf16.mxu1 %v756_v9 }
  0x27   : > { %340 = vmatpush1.bf16.msra.mxu0 %v846_v12  ;;  %396 = vmatpush1.bf16.msra.mxu1 %v846_v12 }
  0x28   : > { %341 = vmatprep.subr.bf16.mxu0 %v756_v9  ;;  %397 = vmatprep.subr.bf16.mxu1 %v756_v9 }
  0x2b   : > { %342 = vmatpush1.bf16.msra.mxu0 %v714_v15  ;;  %398 = vmatpush1.bf16.msra.mxu1 %v714_v15 }
  0x2c   : > { %343 = vmatprep.subr.bf16.mxu0 %v756_v9  ;;  %399 = vmatprep.subr.bf16.mxu1 %v756_v9 }
  0x2f   : > { %344 = vmatpush1.bf16.msra.mxu0 %v715_v16  ;;  %400 = vmatpush1.bf16.msra.mxu1 %v715_v16 }
  0x30   : > { %345 = vmatprep.subr.bf16.mxu0 %v756_v9  ;;  %401 = vmatprep.subr.bf16.mxu1 %v756_v9 }
  0x33   : > { %346 = vmatpush1.bf16.msra.mxu0 %v716_v17  ;;  %402 = vmatpush1.bf16.msra.mxu1 %v716_v17 }
  0x34   : > { %347 = vmatprep.subr.bf16.mxu0 %v756_v9  ;;  %403 = vmatprep.subr.bf16.mxu1 %v756_v9 }
  0x37   : > { %348 = vmatpush1.bf16.msra.mxu0 %v717_v18  ;;  %404 = vmatpush1.bf16.msra.mxu1 %v717_v18 }
  0x38   : > { %349 = vmatprep.subr.bf16.mxu0 %v756_v9  ;;  %405 = vmatprep.subr.bf16.mxu1 %v756_v9 }
  0x3b   : > { %350 = vmatpush1.bf16.msra.mxu0 %v718_v19  ;;  %406 = vmatpush1.bf16.msra.mxu1 %v718_v19 }
  0x3c   : > { %351 = vmatprep.subr.bf16.mxu0 %v756_v9  ;;  %407 = vmatprep.subr.bf16.mxu1 %v756_v9 }
  0x3f   : > { %352 = vmatpush1.bf16.msra.mxu0 %v331_v21  ;;  %408 = vmatpush1.bf16.msra.mxu1 %v331_v21 }
  0x40   : > { %445 = vmatprep.subr.bf16.mxu0 %v756_v9  ;;  %501 = vmatprep.subr.bf16.mxu1 %v756_v9 }
  0x42   : > { %366 = vmatmul.mubr.bf16.vlgmr.msra.gmra.mrb[0].mxu0 %v720_v22  ;;  %422 = vmatmul.mubr.bf16.vlgmr.msra.gmra.mrb[0].mxu1 %v723_v23 }
  0x43   : > { %446 = vmatpush1.bf16.msra.mxu0 %v816_v8  ;;  %502 = vmatpush1.bf16.msra.mxu1 %v816_v8 }
  0x44   : > { %447 = vmatprep.subr.bf16.mxu0 %v756_v9  ;;  %503 = vmatprep.subr.bf16.mxu1 %v756_v9 }
  0x45   : > { %665 = vmatprep.mubr.msk.bf16.mxu0 %vm325_vm0, %v726_v24  ;;  %670 = vmatprep.mubr.msk.bf16.mxu1 %vm325_vm0, %v728_v25 }
  0x47   : > { %448 = vmatpush1.bf16.msra.mxu0 %v825_v10  ;;  %504 = vmatpush1.bf16.msra.mxu1 %v825_v10 }
  0x48   : > { %449 = vmatprep.subr.bf16.mxu0 %v756_v9  ;;  %505 = vmatprep.subr.bf16.mxu1 %v756_v9 }
  0x4b   : > { %450 = vmatpush1.bf16.msra.mxu0 %v835_v11  ;;  %506 = vmatpush1.bf16.msra.mxu1 %v835_v11 }
  0x4c   : > { %451 = vmatprep.subr.bf16.mxu0 %v756_v9  ;;  %507 = vmatprep.subr.bf16.mxu1 %v756_v9 }
  0x4f   : > { %452 = vmatpush1.bf16.msra.mxu0 %v846_v12  ;;  %508 = vmatpush1.bf16.msra.mxu1 %v846_v12 }
  0x50   : > { %453 = vmatprep.subr.bf16.mxu0 %v756_v9  ;;  %509 = vmatprep.subr.bf16.mxu1 %v756_v9 }
  0x53   : > { %454 = vmatpush1.bf16.msra.mxu0 %v714_v15  ;;  %510 = vmatpush1.bf16.msra.mxu1 %v714_v15 }
  0x54   : > { %455 = vmatprep.subr.bf16.mxu0 %v756_v9  ;;  %511 = vmatprep.subr.bf16.mxu1 %v756_v9 }
  0x57   : > { %456 = vmatpush1.bf16.msra.mxu0 %v715_v16  ;;  %512 = vmatpush1.bf16.msra.mxu1 %v715_v16 }
  0x58   : > { %457 = vmatprep.subr.bf16.mxu0 %v756_v9  ;;  %513 = vmatprep.subr.bf16.mxu1 %v756_v9 }
  0x5b   : > { %458 = vmatpush1.bf16.msra.mxu0 %v716_v17  ;;  %514 = vmatpush1.bf16.msra.mxu1 %v716_v17 }
  0x5c   : > { %459 = vmatprep.subr.bf16.mxu0 %v756_v9  ;;  %515 = vmatprep.subr.bf16.mxu1 %v756_v9 }
  0x5f   : > { %460 = vmatpush1.bf16.msra.mxu0 %v717_v18  ;;  %516 = vmatpush1.bf16.msra.mxu1 %v717_v18 }
  0x60   : > { %461 = vmatprep.subr.bf16.mxu0 %v756_v9  ;;  %517 = vmatprep.subr.bf16.mxu1 %v756_v9 }
  0x63   : > { %462 = vmatpush1.bf16.msra.mxu0 %v718_v19  ;;  %518 = vmatpush1.bf16.msra.mxu1 %v718_v19 }
  0x64   : > { %463 = vmatprep.subr.bf16.mxu0 %v756_v9  ;;  %519 = vmatprep.subr.bf16.mxu1 %v756_v9 }
  0x67   : > { %464 = vmatpush1.bf16.msra.mxu0 %v331_v21  ;;  %520 = vmatpush1.bf16.msra.mxu1 %v331_v21 }
  0x6a   : > { %478 = vmatmul.mubr.bf16.vlgmr.msra.gmra.mrb[4].mxu0 %v730_v26  ;;  %534 = vmatmul.mubr.bf16.vlgmr.msra.gmra.mrb[4].mxu1 %v731_v27 }
 0x115   : > { %v367_v28 = vpop.f32.mrb[0].mxu0  ;;  %v423_v29 = vpop.f32.mrb[0].mxu1 }
 0x116   : > { %v542_v30 = vmax.f32 %v367_v28, %v423_v29  ;;  %v369_v31 = vpop.f32.mrb[1].mxu0  ;;  %v425_v32 = vpop.f32.mrb[1].mxu1 }
 0x117   : > { %v370_v33 = vpop.f32.mrb[2].mxu0  ;;  %v426_v34 = vpop.f32.mrb[2].mxu1 }
 0x118   : > { %v543_v35 = vmax.f32 %v370_v33, %v426_v34  ;;  %v372_v36 = vpop.f32.mrb[3].mxu0  ;;  %v428_v37 = vpop.f32.mrb[3].mxu1 }
 0x13d   : > { %v479_v38 = vpop.f32.mrb[4].mxu0  ;;  %v535_v39 = vpop.f32.mrb[4].mxu1 }
 0x13e   : > { %v544_v40 = vmax.f32 %v479_v38, %v535_v39  ;;  %v481_v41 = vpop.f32.mrb[5].mxu0  ;;  %v537_v42 = vpop.f32.mrb[5].mxu1 }
 0x13f   : > { %v482_v44 = vpop.f32.mrb[6].mxu0  ;;  %v538_v45 = vpop.f32.mrb[6].mxu1 }
 0x140   : > { %v546_v46 = vmax.f32 %v542_v30, %v544_v40  ;;  %v545_v47 = vmax.f32 %v482_v44, %v538_v45  ;;  %v484_v48 = vpop.f32.mrb[7].mxu0  ;;  %v540_v49 = vpop.f32.mrb[7].mxu1 }
 0x142   : > { %v555_v50 = vadd.f32 %v671_v43, %v546_v46  ;;  %v547_v51 = vmax.f32 %v543_v35, %v545_v47 }
 0x144   : > { %v556_v52 = vadd.f32 %v671_v43, %v547_v51  ;;  %v557_v53 = vmax.f32 %v555_v50, 0.0 }
 0x146   : > { %v558_v54 = vmax.f32 %v556_v52, 0.0 }
 0x148   : > { %v683_v55 = vpack.c.bf16 %v558_v54, %v557_v53 }
 0x14a   : > { %684 = vst [vmem:[%s235_s5] sm:$0xff] %v683_v55  }
 0x14b PF: > { %p10_p9 = scmp.ge.s32.totalorder %s794_s16, 6   ;;  %s944_s12 = smov %s750_s13 }
 0x14c   : > { %s945_s13 = smov %s803_s19  ;;  %s946_s14 = smov %s794_s16 }
 0x14d   :  { %12 = sbr.rel (!%p10_p9) target bundleno = 2 (0x2), region = 108 }

// kernel: simple_cnn_forward.5
= control target key start
LH: loop header
LB: loop body
LE: loop exit
PB: predicated region body
PF: predicated region fallthrough
CT: control target
= control target key end

     0   :  { %v758_v0 = vmov 0   ;;  %vm257_vm0 = vcmask 130048   ;;  %v759_v30 = vmov 0.0   ;;  %vm760_vm1 = vmmov 0   ;;  %s978_s1 = inlined_call_operand.vmem [shape: bf16[400,128], index: 1, kind: input, shape index: {}]   ;;  %s979_s0 = inlined_call_operand.vmem [shape: bf16[16,400], index: 0, kind: input, shape index: {}]   ;;  %s980_s3 = inlined_call_operand.vmem [shape: bf16[128,128], index: 3, kind: input, shape index: {}]   ;;  %s981_s5 = inlined_call_operand.vmem [shape: bf16[128,128], index: 5, kind: input, shape index: {}]   ;;  %s982_s2 = inlined_call_operand.vmem [shape: f32[1,128], index: 2, kind: input, shape index: {}]   ;;  %s983_s4 = inlined_call_operand.vmem [shape: f32[1,128], index: 4, kind: input, shape index: {}]   ;;  %s984_s6 = inlined_call_operand.vmem [shape: f32[1,128], index: 6, kind: input, shape index: {}]   ;;  %s985_s7 = inlined_call_operand.vmem [shape: f32[16,128], index: 7, kind: output, shape index: {}]  }
   0x1   :  { %302 = vmatprep.subr.bf16.mxu1 %v758_v0  ;;  %v711_v1 = vld [vmem:[%s978_s1 + $0x40] sm:$0xff]   ;;  %v714_v4 = vld [vmem:[%s978_s1 + $0x48] sm:$0xff]   ;;  %v717_v7 = vld [vmem:[%s978_s1 + $0x50] sm:$0xff]  }
   0x2   :  { %v712_v2 = vld [vmem:[%s978_s1 + $0x80] sm:$0xff]   ;;  %628 = vmatprep.subr.bf16.mxu0 %v711_v1  ;;  %v715_v5 = vld [vmem:[%s978_s1 + $0x88] sm:$0xff]   ;;  %v718_v8 = vld [vmem:[%s978_s1 + $0x90] sm:$0xff]  }
   0x3   :  { %v713_v3 = vld [vmem:[%s978_s1] sm:$0xff]   ;;  %303 = vmatpush1.bf16.msra.mxu1 %v712_v2  ;;  %v716_v6 = vld [vmem:[%s978_s1 + $0x8] sm:$0xff]   ;;  %v719_v9 = vld [vmem:[%s978_s1 + $0x10] sm:$0xff]  }
   0x4   :  { %629 = vmatpush3.bf16.msra.mxu0 %v713_v3  ;;  %304 = vmatprep.subr.bf16.mxu1 %v758_v0  ;;  %v720_v10 = vld [vmem:[%s978_s1 + $0x58] sm:$0xff]   ;;  %v723_v13 = vld [vmem:[%s978_s1 + $0x60] sm:$0xff]   ;;  %v726_v16 = vld [vmem:[%s978_s1 + $0x68] sm:$0xff]  }
   0x5   :  { %630 = vmatprep.subr.bf16.mxu0 %v714_v4  ;;  %v721_v11 = vld [vmem:[%s978_s1 + $0x98] sm:$0xff]   ;;  %v724_v14 = vld [vmem:[%s978_s1 + $0xa0] sm:$0xff]   ;;  %v727_v17 = vld [vmem:[%s978_s1 + $0xa8] sm:$0xff]  }
   0x6   :  { %v722_v12 = vld [vmem:[%s978_s1 + $0x18] sm:$0xff]   ;;  %v725_v15 = vld [vmem:[%s978_s1 + $0x20] sm:$0xff]   ;;  %v728_v18 = vld [vmem:[%s978_s1 + $0x28] sm:$0xff]  }
   0x7   :  { %305 = vmatpush1.bf16.msra.mxu1 %v715_v5  ;;  %v729_v19 = vld [vmem:[%s978_s1 + $0x70] sm:$0xff]   ;;  %v732_v22 = vld [vmem:[%s978_s1 + $0x78] sm:$0xff]   ;;  %v738_v28 = vld [vmem:[%s978_s1 + $0xc0] sm:$0xff]  }
   0x8   :  { %631 = vmatpush3.bf16.msra.mxu0 %v716_v6  ;;  %306 = vmatprep.subr.bf16.mxu1 %v758_v0  ;;  %v730_v20 = vld [vmem:[%s978_s1 + $0xb0] sm:$0xff]   ;;  %v733_v24 = vld [vmem:[%s978_s1 + $0xb8] sm:$0xff]   ;;  %v742_v29 = vld [vmem:[%s980_s3] sm:$0xff]  }
   0x9   :  { %632 = vmatprep.subr.bf16.mxu0 %v717_v7  ;;  %v731_v21 = vld [vmem:[%s978_s1 + $0x30] sm:$0xff]   ;;  %v741_v25 = vld [vmem:[%s979_s0 + $0xc] ss:$16 sps:$4 sm:$0xff]   ;;  %v739_v31 = vld [vmem:[%s979_s0 + $0x8] ss:$16 sps:$4 sm:$0xff]  }
   0xa   :  { %v737_v23 = vld [vmem:[%s979_s0 + $0x4] ss:$16 sps:$4 sm:$0xff]   ;;  %v734_v26 = vld [vmem:[%s978_s1 + $0x38] sm:$0xff]   ;;  %609 = vmatprep.mubr.msk.bf16.mxu1 %vm257_vm0, %v741_v25  ;;  %v735_v27 = vld [vmem:[%s979_s0] ss:$16 sps:$4 sm:$0xff]  }
   0xb   :  { %307 = vmatpush1.bf16.msra.mxu1 %v718_v8  ;;  %293 = vmatprep.mubr.bf16.mxu0 %v737_v23  ;;  %v743_v32 = vld [vmem:[%s980_s3 + $0x8] sm:$0xff]   ;;  %v744_v33 = vld [vmem:[%s980_s3 + $0x10] sm:$0xff]   ;;  %v745_v34 = vld [vmem:[%s980_s3 + $0x18] sm:$0xff]  }
   0xc   :  { %633 = vmatpush3.bf16.msra.mxu0 %v719_v9  ;;  %308 = vmatprep.subr.bf16.mxu1 %v758_v0  ;;  %v746_v35 = vld [vmem:[%s980_s3 + $0x20] sm:$0xff]   ;;  %v747_v36 = vld [vmem:[%s980_s3 + $0x28] sm:$0xff]   ;;  %v748_v37 = vld [vmem:[%s980_s3 + $0x30] sm:$0xff]  }
   0xd   :  { %634 = vmatprep.subr.bf16.mxu0 %v720_v10  ;;  %v749_v38 = vld [vmem:[%s980_s3 + $0x38] sm:$0xff]   ;;  %v750_v39 = vld [vmem:[%s981_s5] sm:$0xff]   ;;  %v751_v40 = vld [vmem:[%s981_s5 + $0x8] sm:$0xff]  }
   0xe   :  { %v752_v41 = vld [vmem:[%s981_s5 + $0x10] sm:$0xff]   ;;  %v753_v42 = vld [vmem:[%s981_s5 + $0x18] sm:$0xff]   ;;  %v754_v43 = vld [vmem:[%s981_s5 + $0x20] sm:$0xff]  }
   0xf   :  { %309 = vmatpush1.bf16.msra.mxu1 %v721_v11  ;;  %v755_v44 = vld [vmem:[%s981_s5 + $0x28] sm:$0xff]   ;;  %v579_v47 = vld [vmem:[%s982_s2] ss:$0 sm:$0xff]  ;;  %v756_v63 = vld [vmem:[%s981_s5 + $0x30] sm:$0xff]  }
  0x10   :  { %635 = vmatpush3.bf16.msra.mxu0 %v722_v12  ;;  %310 = vmatprep.subr.bf16.mxu1 %v758_v0  ;;  %v610_v1 = vld [vmem:[%s983_s4] ss:$0 sm:$0xff] }
  0x11   :  { %636 = vmatprep.subr.bf16.mxu0 %v723_v13  ;;  %v619_v11 = vld [vmem:[%s984_s6] ss:$0 sm:$0xff] }
  0x13   :  { %311 = vmatpush1.bf16.msra.mxu1 %v724_v14 }
  0x14   :  { %637 = vmatpush3.bf16.msra.mxu0 %v725_v15  ;;  %312 = vmatprep.subr.bf16.mxu1 %v758_v0 }
  0x15   :  { %638 = vmatprep.subr.bf16.mxu0 %v726_v16 }
  0x17   :  { %313 = vmatpush1.bf16.msra.mxu1 %v727_v17 }
  0x18   :  { %639 = vmatpush3.bf16.msra.mxu0 %v728_v18  ;;  %314 = vmatprep.subr.bf16.mxu1 %v758_v0 }
  0x19   :  { %640 = vmatprep.subr.bf16.mxu0 %v729_v19 }
  0x1b   :  { %315 = vmatpush1.bf16.msra.mxu1 %v730_v20 }
  0x1c   :  { %641 = vmatpush3.bf16.msra.mxu0 %v731_v21  ;;  %316 = vmatprep.subr.bf16.mxu1 %v758_v0 }
  0x1d   :  { %642 = vmatprep.subr.bf16.mxu0 %v732_v22 }
  0x1f   :  { %317 = vmatpush1.bf16.msra.mxu1 %v733_v24 }
  0x20   :  { %643 = vmatpush3.bf16.msra.mxu0 %v734_v26  ;;  %318 = vmatprep.subr.bf16.mxu1 %v758_v0  ;;  %v757_v0 = vld [vmem:[%s981_s5 + $0x38] sm:$0xff]  }
  0x21   :  { %668 = vmatprep.subr.bf16.mxu0 %v759_v30 }
  0x23   :  { %294 = vmatmul.mubr.bf16.vlgmr.msra.gmra.mrb[0].mxu0 %v735_v27  ;;  %319 = vmatpush1.bf16.msra.mxu1 %v738_v28 }
  0x24   :  { %669 = vmatpush3.bf16.msra.mxu0 %v742_v29  ;;  %688 = vmatprep.subr.bf16.mxu1 %v759_v30 }
  0x25   :  { %670 = vmatprep.subr.bf16.mxu0 %v759_v30  ;;  %684 = vmatprep.mubr.msk.bf16.mxu0 %vm760_vm1, %v759_v30 }
  0x26   :  { %335 = vmatmul.mubr.bf16.vlgmr.msra.gmra.mrb[0].mxu1 %v739_v31 }
  0x27   :  { %704 = vmatprep.mubr.msk.bf16.mxu1 %vm760_vm1, %v759_v30  ;;  %689 = vmatpush3.bf16.msra.mxu1 %v750_v39 }
  0x28   :  { %671 = vmatpush3.bf16.msra.mxu0 %v743_v32  ;;  %690 = vmatprep.subr.bf16.mxu1 %v759_v30 }
  0x29   :  { %672 = vmatprep.subr.bf16.mxu0 %v759_v30 }
  0x2b   :  { %691 = vmatpush3.bf16.msra.mxu1 %v751_v40 }
  0x2c   :  { %673 = vmatpush3.bf16.msra.mxu0 %v744_v33  ;;  %692 = vmatprep.subr.bf16.mxu1 %v759_v30 }
  0x2d   :  { %674 = vmatprep.subr.bf16.mxu0 %v759_v30 }
  0x2f   :  { %693 = vmatpush3.bf16.msra.mxu1 %v752_v41 }
  0x30   :  { %675 = vmatpush3.bf16.msra.mxu0 %v745_v34  ;;  %694 = vmatprep.subr.bf16.mxu1 %v759_v30 }
  0x31   :  { %676 = vmatprep.subr.bf16.mxu0 %v759_v30 }
  0x33   :  { %695 = vmatpush3.bf16.msra.mxu1 %v753_v42 }
  0x34   :  { %677 = vmatpush3.bf16.msra.mxu0 %v746_v35  ;;  %696 = vmatprep.subr.bf16.mxu1 %v759_v30 }
  0x35   :  { %678 = vmatprep.subr.bf16.mxu0 %v759_v30 }
  0x37   :  { %697 = vmatpush3.bf16.msra.mxu1 %v754_v43 }
  0x38   :  { %679 = vmatpush3.bf16.msra.mxu0 %v747_v36  ;;  %698 = vmatprep.subr.bf16.mxu1 %v759_v30 }
  0x39   :  { %680 = vmatprep.subr.bf16.mxu0 %v759_v30 }
  0x3b   :  { %699 = vmatpush3.bf16.msra.mxu1 %v755_v44 }
  0x3c   :  { %681 = vmatpush3.bf16.msra.mxu0 %v748_v37  ;;  %700 = vmatprep.subr.bf16.mxu1 %v759_v30 }
  0x3d   :  { %682 = vmatprep.subr.bf16.mxu0 %v759_v30 }
  0x3f   :  { %701 = vmatpush3.bf16.msra.mxu1 %v756_v63 }
  0x40   :  { %683 = vmatpush3.bf16.msra.mxu0 %v749_v38  ;;  %702 = vmatprep.subr.bf16.mxu1 %v759_v30 }
  0x43   :  { %703 = vmatpush3.bf16.msra.mxu1 %v757_v0 }
  0xf6   :  { %v644_v45 = vpop.f32.mrb[0].mxu0 }
  0xf7   :  { %v645_v46 = vpop.f32.mrb[1].mxu0 }
  0xf8   :  { %v646_v48 = vadd.f32 %v645_v46, %v644_v45  ;;  %v647_v49 = vpop.f32.mrb[2].mxu0 }
  0xf9   :  { %v648_v50 = vpop.f32.mrb[3].mxu0  ;;  %v336_v51 = vpop.f32.mrb[0].mxu1 }
  0xfa   :  { %v649_v52 = vadd.f32 %v648_v50, %v647_v49  ;;  %v296_v53 = vadd.f32 %v646_v48, %v579_v47  ;;  %v338_v54 = vpop.f32.mrb[1].mxu1 }
  0xfb   :  { %v339_v55 = vpop.f32.mrb[2].mxu1 }
  0xfc   :  { %v337_v56 = vadd.f32 %v336_v51, %v296_v53  ;;  %v299_v57 = vadd.f32 %v649_v52, %v579_v47  ;;  %v341_v58 = vpop.f32.mrb[3].mxu1 }
  0xfe   :  { %v340_v59 = vadd.f32 %v339_v55, %v299_v57  ;;  %v343_v60 = vmax.f32 %v337_v56, 0.0 }
 0x100   :  { %v344_v61 = vmax.f32 %v340_v59, 0.0 }
 0x102   :  { %v345_v62 = vpack.c.bf16 %v344_v61, %v343_v60 }
 0x104   :  { %685 = vmatmul.mubr.bf16.vlgmr.msra.gmra.mrb[4].mxu0 %v345_v62 }
 0x1d7   :  { %v451_v2 = vpop.f32.mrb[4].mxu0 }
 0x1d8   :  { %v452_v3 = vadd.f32 %v610_v1, %v451_v2  ;;  %v686_v4 = vpop.f32.mrb[5].mxu0 }
 0x1d9   :  { %v454_v5 = vpop.f32.mrb[6].mxu0 }
 0x1da   :  { %v455_v6 = vadd.f32 %v610_v1, %v454_v5  ;;  %v687_v7 = vpop.f32.mrb[7].mxu0  ;;  %v458_v8 = vmax.f32 %v452_v3, 0.0 }
 0x1dc   :  { %v459_v9 = vmax.f32 %v455_v6, 0.0 }
 0x1de   :  { %v460_v10 = vpack.c.bf16 %v459_v9, %v458_v8 }
 0x1e0   :  { %705 = vmatmul.mubr.bf16.vlgmr.msra.gmra.mrb[4].mxu1 %v460_v10 }
 0x2b3   :  { %v566_v12 = vpop.f32.mrb[4].mxu1 }
 0x2b4   :  { %v567_v13 = vadd.f32 %v619_v11, %v566_v12  ;;  %v706_v14 = vpop.f32.mrb[5].mxu1 }
 0x2b5   :  { %v569_v15 = vpop.f32.mrb[6].mxu1 }
 0x2b6   :  { %573 = vst [vmem:[%s985_s7] sm:$0xff] %v567_v13  ;;  %v570_v16 = vadd.f32 %v619_v11, %v569_v15  ;;  %v707_v17 = vpop.f32.mrb[7].mxu1 }
 0x2b8   :  { %574 = vst [vmem:[%s985_s7 + $0x8] sm:$0xff] %v570_v16 }

</bundles_post_ra>
